<compile_context>
chip_gen: v7x
topology: tpu7x:2x2x1
jax: 0.10.0
libtpu: 0.0.40
codegen_flags: <defaults>
</compile_context>

<pallas_src>
import math

import jax
import jax.numpy as jnp
from jax.experimental import pallas as pl
from jax.experimental.pallas import tpu as pltpu

SUBLANE = 8
LANE = 128
_MAX_BATCH_TILE = 2048                  # rows; review: bigger tiles amortize step overhead
_VMEM_TILE_BUDGET = 12 * 1024 * 1024    # per-step activation/intermediate budget (bytes)
_VMEM_LIMIT = 32 * 1024 * 1024          # explicit scoped-VMEM limit, safe on v5e/v6e/v7x
_NEG_SLOPE = 0.1                        # LeakyReLU slope used by LinearBlock


def _round_up(x, m):
    return (x + m - 1) // m * m


def _pad2d(x, rows, cols, value=0.0):
    r, c = x.shape
    return jnp.pad(x, ((0, rows - r), (0, cols - c)), constant_values=value)


# ---------------------------------------------------------------------------
# Fused Pallas kernel: all LinearBlocks + final dense in one body.
# refs layout (inputs): [act_0..act_{nc-1},
#                        w0_chunk_0..w0_chunk_{nc-1}, shift_0,
#                        w_1, shift_1, ..., w_{nb-1}, shift_{nb-1},
#                        w_final, b_final], then o_ref (output).
# ---------------------------------------------------------------------------
def _make_fused_kernel(n_chunks, n_blocks, compute_dtype):
    def _leaky_relu(y):
        return jnp.where(y >= 0.0, y, _NEG_SLOPE * y)

    def _chunk_matmul(a, w):
        # a: (TB, K) activation chunk, w: (K, Np) weight chunk, f32 accumulate.
        k = a.shape[-1]
        if k < SUBLANE or (k % SUBLANE) != 0:
            # Tiny / sublane-unaligned contraction (e.g. latlons K=2,
            # pred_month K=12): unrolled rank-1 updates on the VPU instead of
            # a degenerate-K MXU matmul.  MXU/VPU both have huge slack here.
            a32 = a.astype(jnp.float32)
            w32 = w.astype(jnp.float32)
            out = a32[:, 0:1] * w32[0:1, :]
            for kk in range(1, k):
                out = out + a32[:, kk:kk + 1] * w32[kk:kk + 1, :]
            return out
        return jnp.dot(a.astype(compute_dtype), w,
                       preferred_element_type=jnp.float32)

    def kernel(*refs):
        o_ref = refs[-1]
        refs = refs[:-1]
        acts = refs[:n_chunks]
        idx = n_chunks

        # ---- LinearBlock 0: first-layer matmul split over K so the wrapper
        #      never has to concatenate x / pred_month / latlons in HBM.
        y = _chunk_matmul(acts[0][...], refs[idx][...])
        for c in range(1, n_chunks):
            y = y + _chunk_matmul(acts[c][...], refs[idx + c][...])
        idx += n_chunks
        y = y + refs[idx][...]            # eval-mode BatchNorm shift (scale in W)
        idx += 1
        h = _leaky_relu(y)
        # Dropout is identity in eval mode -> nothing to do.

        # ---- LinearBlocks 1..n-1 (K and N both 128-lane padded; pads stay 0)
        for _ in range(1, n_blocks):
            w = refs[idx][...]
            shift = refs[idx + 1][...]
            idx += 2
            y = jnp.dot(h.astype(compute_dtype), w,
                        preferred_element_type=jnp.float32) + shift
            h = _leaky_relu(y)

        # ---- final dense: (TB, Np) @ (Np, 1) + b -> (TB, 1)
        wf = refs[idx][...]
        bf = refs[idx + 1][...]
        o_ref[...] = jnp.dot(h.astype(compute_dtype), wf,
                             preferred_element_type=jnp.float32) + bf

    return kernel


# ---------------------------------------------------------------------------
# Parameter construction (mirrors LinearModel.init_weights), BN fold +
# transpose + K-split + padding done ONCE here, not in the per-call hot path.
# ---------------------------------------------------------------------------
def _kaiming_uniform(key, out_features, in_features):
    # nn.init.kaiming_uniform_ defaults: a=0, fan_in, leaky_relu -> bound=sqrt(6/fan_in)
    bound = math.sqrt(6.0 / in_features)
    return jax.random.uniform(
        key, (out_features, in_features), jnp.float32, minval=-bound, maxval=bound
    )


def build_params(key, layer_sizes, x_features, include_pred_month=True,
                 include_latlons=True, compute_dtype=jnp.float32):
    # Feature chunks in the same order as the torch.cat calls in the module.
    chunk_sizes = [x_features]
    if include_pred_month:
        chunk_sizes.append(12)
    if include_latlons:
        chunk_sizes.append(2)
    input_size = sum(chunk_sizes)

    sizes = [input_size] + list(layer_sizes)
    keys = jax.random.split(key, len(layer_sizes) + 1)
    eps = 1e-5
    blocks = []
    for i in range(1, len(sizes)):
        in_f, out_f = sizes[i - 1], sizes[i]
        # LinearBlock: nn.Linear(bias=False) -> only BN statistics to fold.
        w = _kaiming_uniform(keys[i - 1], out_f, in_f)       # PyTorch [out, in]
        gamma = jnp.ones((out_f,), jnp.float32)
        beta = jnp.zeros((out_f,), jnp.float32)
        running_mean = jnp.zeros((out_f,), jnp.float32)
        running_var = jnp.ones((out_f,), jnp.float32)
        scale = gamma / jnp.sqrt(running_var + eps)
        shift = beta - running_mean * scale
        np_ = _round_up(out_f, LANE)
        w_fused = w.T * scale[None, :]                       # (in_f, out_f), BN folded
        if i == 1:
            # Split along K to match the un-concatenated input chunks.
            w_chunks, off = [], 0
            for cs in chunk_sizes:
                w_chunks.append(
                    _pad2d(w_fused[off:off + cs, :], cs, np_).astype(compute_dtype))
                off += cs
        else:
            kp = _round_up(in_f, LANE)                       # == previous layer's Np
            w_chunks = [_pad2d(w_fused, kp, np_).astype(compute_dtype)]
        blocks.append({
            "w_chunks": w_chunks,
            "shift": _pad2d(shift[None, :], 1, np_),         # f32, added post-accumulate
        })

    # final_dense: kaiming_uniform weight, bias = 0 (per init_weights).
    wf = _kaiming_uniform(keys[-1], 1, sizes[-1])            # [1, last]
    klp = _round_up(sizes[-1], LANE)
    final = {
        "w": _pad2d(wf.T, klp, 1).astype(compute_dtype),     # (klp, 1)
        "b": jnp.zeros((1, 1), jnp.float32),
    }
    return {
        "blocks": blocks,
        "final": final,
        "chunk_sizes": chunk_sizes,
        "compute_dtype": compute_dtype,
        "include_pred_month": include_pred_month,
        "include_latlons": include_latlons,
    }


# ---------------------------------------------------------------------------
# Batch-tile selection: big VMEM-budgeted tiles, >=2 tiles for v7x megacore,
# last tile nearly full (minimal padded/wasted rows).
# ---------------------------------------------------------------------------
def _choose_batch_tile(B, act_row_bytes, hidden_row_bytes):
    b8 = _round_up(B, SUBLANE)
    if b8 <= SUBLANE:
        return b8                                            # tiny batch: one tile
    per_row = 2 * act_row_bytes + hidden_row_bytes           # 2x = double-buffered inputs
    tb_max = (_VMEM_TILE_BUDGET // max(per_row, 1)) // SUBLANE * SUBLANE
    tb_max = max(SUBLANE, min(_MAX_BATCH_TILE, tb_max))
    n_tiles = max(2, pl.cdiv(b8, tb_max))                    # >=2 so both v7x TCs get work
    return _round_up(pl.cdiv(b8, n_tiles), SUBLANE)


def _resident_spec(shape, single_buffer):
    """Constant-block-index (weight/shift) operand: block == full array."""
    index_map = lambda i: (0,) * len(shape)
    if single_buffer:
        # Their block index never changes -> double-buffering is pure VMEM waste.
        return pl.BlockSpec(shape, index_map, pipeline_mode=pl.Buffered(1))
    return pl.BlockSpec(shape, index_map)


# ---------------------------------------------------------------------------
# Forward pass (single pallas_call; no wrapper-side concat/pad, (B,1) output)
# ---------------------------------------------------------------------------
def linear_model_forward(params, x, pred_month=None, latlons=None):
    compute_dtype = params["compute_dtype"]
    chunk_sizes = params["chunk_sizes"]

    B = x.shape[0]
    act_chunks = [x.reshape(B, -1)]                          # row-major reshape: free
    if params["include_pred_month"]:
        act_chunks.append(pred_month)
    if params["include_latlons"]:
        act_chunks.append(latlons)
    act_chunks = [a.astype(compute_dtype) for a in act_chunks]
    assert [a.shape[1] for a in act_chunks] == chunk_sizes, "params/input mismatch"

    act_itemsize = jnp.dtype(compute_dtype).itemsize
    max_np = max(blk["shift"].shape[1] for blk in params["blocks"])
    TB = _choose_batch_tile(B, sum(chunk_sizes) * act_itemsize, 2 * 4 * max_np)
    n_tiles = pl.cdiv(B, TB)                                 # partial last tile is masked

    n_chunks = len(act_chunks)
    n_blocks = len(params["blocks"])
    kernel = _make_fused_kernel(n_chunks, n_blocks, compute_dtype)

    act_specs = [pl.BlockSpec((TB, a.shape[1]), lambda i: (i, 0)) for a in act_chunks]
    weights = []
    for blk in params["blocks"]:
        weights += list(blk["w_chunks"]) + [blk["shift"]]
    weights += [params["final"]["w"], params["final"]["b"]]
    operands = act_chunks + weights

    def run(single_buffer_weights):
        w_specs = [_resident_spec(w.shape, single_buffer_weights) for w in weights]
        return pl.pallas_call(
            kernel,
            out_shape=jax.ShapeDtypeStruct((B, 1), jnp.float32),
            grid=(n_tiles,),
            in_specs=act_specs + w_specs,
            out_specs=pl.BlockSpec((TB, 1), lambda i: (i, 0)),
            compiler_params=pltpu.CompilerParams(
                dimension_semantics=("parallel",),           # shard batch tiles (v7x)
                vmem_limit_bytes=_VMEM_LIMIT,
            ),
        )(*operands)

    try:
        return run(True)
    except Exception:
        # TODO(synk): pipeline_mode=pl.Buffered(1) not supported by this
        #             jax/Mosaic build; fall back to default double buffering.
        return run(False)


# ---------------------------------------------------------------------------
# Pure-JAX reference (same folded/padded params) for correctness checking.
# ---------------------------------------------------------------------------
def _reference_forward(params, x, pred_month=None, latlons=None):
    B = x.shape[0]
    chunks = [x.reshape(B, -1).astype(jnp.float32)]
    if params["include_pred_month"]:
        chunks.append(pred_month.astype(jnp.float32))
    if params["include_latlons"]:
        chunks.append(latlons.astype(jnp.float32))
    blk0 = params["blocks"][0]
    y = sum(c @ w.astype(jnp.float32) for c, w in zip(chunks, blk0["w_chunks"]))
    y = y + blk0["shift"]
    h = jnp.where(y >= 0.0, y, _NEG_SLOPE * y)
    for blk in params["blocks"][1:]:
        y = h @ blk["w_chunks"][0].astype(jnp.float32) + blk["shift"]
        h = jnp.where(y >= 0.0, y, _NEG_SLOPE * y)
    return h @ params["final"]["w"].astype(jnp.float32) + params["final"]["b"]


# ---------------------------------------------------------------------------
if __name__ == "__main__":
    key = jax.random.PRNGKey(0)
    k_x, k_pm, k_ll, k_params, k_x2, k_pm2, k_ll2 = jax.random.split(key, 7)

    # Small shapes consistent with the module:
    #   x: (batch=2, timesteps=8, features=4) -> flattened 32
    #   pred_month one-hot: (2, 12), latlons: (2, 2)
    batch, seq, feat = 2, 8, 4
    layer_sizes = [32, 16]
    params = build_params(k_params, layer_sizes, x_features=seq * feat,
                          include_pred_month=True, include_latlons=True)

    x = jax.random.normal(k_x, (batch, seq, feat), jnp.float32)
    pred_month = jax.nn.one_hot(
        jax.random.randint(k_pm, (batch,), 0, 12), 12, dtype=jnp.float32)
    latlons = jax.random.normal(k_ll, (batch, 2), jnp.float32)

    out = linear_model_forward(params, x, pred_month=pred_month, latlons=latlons)
    out = jax.block_until_ready(out)
    assert out.shape == (batch, 1), out.shape
    assert bool(jnp.all(jnp.isfinite(out)))
    ref = _reference_forward(params, x, pred_month=pred_month, latlons=latlons)
    assert bool(jnp.allclose(out, ref, rtol=1e-2, atol=1e-2))

    # Second run with a larger, non-tile-aligned batch to exercise the
    # multi-tile "parallel" grid and the masked partial last tile.
    batch2 = 300
    x2 = jax.random.normal(k_x2, (batch2, seq, feat), jnp.float32)
    pred_month2 = jax.nn.one_hot(
        jax.random.randint(k_pm2, (batch2,), 0, 12), 12, dtype=jnp.float32)
    latlons2 = jax.random.normal(k_ll2, (batch2, 2), jnp.float32)
    out2 = linear_model_forward(params, x2, pred_month=pred_month2, latlons=latlons2)
    out2 = jax.block_until_ready(out2)
    assert out2.shape == (batch2, 1), out2.shape
    ref2 = _reference_forward(params, x2, pred_month=pred_month2, latlons=latlons2)
    assert bool(jnp.allclose(out2, ref2, rtol=1e-2, atol=1e-2))

    print("KERNEL_OK")
</pallas_src>

<mosaic_0001>
module attributes {stable_mosaic.version = 11 : i64} {
  func.func @kernel(%arg0: i32, %arg1: memref<8x32xf32, #tpu.memory_space<vmem>>, %arg2: memref<8x12xf32, #tpu.memory_space<vmem>>, %arg3: memref<8x2xf32, #tpu.memory_space<vmem>>, %arg4: memref<32x128xf32, #tpu.memory_space<vmem>>, %arg5: memref<12x128xf32, #tpu.memory_space<vmem>>, %arg6: memref<2x128xf32, #tpu.memory_space<vmem>>, %arg7: memref<1x128xf32, #tpu.memory_space<vmem>>, %arg8: memref<128x128xf32, #tpu.memory_space<vmem>>, %arg9: memref<1x128xf32, #tpu.memory_space<vmem>>, %arg10: memref<128x1xf32, #tpu.memory_space<vmem>>, %arg11: memref<1x1xf32, #tpu.memory_space<vmem>>, %arg12: memref<8x1xf32, #tpu.memory_space<vmem>>) attributes {dimension_semantics = [#tpu.dimension_semantics<parallel>], iteration_bounds = array<i64: 1>, scalar_prefetch = 0 : i64, scratch_operands = 0 : i64, tpu.core_type = #tpu.core_type<tc>, window_params = [{transform_indices = @transform_0, window_bounds = array<i64: 8, 32>}, {transform_indices = @transform_1, window_bounds = array<i64: 8, 12>}, {transform_indices = @transform_2, window_bounds = array<i64: 8, 2>}, {pipeline_mode = #tpu.pipeline_mode<synchronous>, transform_indices = @transform_3, window_bounds = array<i64: 32, 128>}, {pipeline_mode = #tpu.pipeline_mode<synchronous>, transform_indices = @transform_4, window_bounds = array<i64: 12, 128>}, {pipeline_mode = #tpu.pipeline_mode<synchronous>, transform_indices = @transform_5, window_bounds = array<i64: 2, 128>}, {pipeline_mode = #tpu.pipeline_mode<synchronous>, transform_indices = @transform_6, window_bounds = array<i64: 1, 128>}, {pipeline_mode = #tpu.pipeline_mode<synchronous>, transform_indices = @transform_7, window_bounds = array<i64: 128, 128>}, {pipeline_mode = #tpu.pipeline_mode<synchronous>, transform_indices = @transform_8, window_bounds = array<i64: 1, 128>}, {pipeline_mode = #tpu.pipeline_mode<synchronous>, transform_indices = @transform_9, window_bounds = array<i64: 128, 1>}, {pipeline_mode = #tpu.pipeline_mode<synchronous>, transform_indices = @transform_10, window_bounds = array<i64: 1, 1>}, {transform_indices = @transform_11, window_bounds = array<i64: 8, 1>}]} {
    %c0 = arith.constant 0 : index
    %c0_0 = arith.constant 0 : index
    %0 = vector.load %arg1[%c0, %c0_0] : memref<8x32xf32, #tpu.memory_space<vmem>>, vector<8x32xf32>
    %c0_1 = arith.constant 0 : index
    %c0_2 = arith.constant 0 : index
    %1 = vector.load %arg4[%c0_1, %c0_2] : memref<32x128xf32, #tpu.memory_space<vmem>>, vector<32x128xf32>
    %cst = arith.constant dense<0.000000e+00> : vector<8x128xf32>
    %2 = tpu.matmul %0, %1, %cst {dimension_numbers = #tpu.dot_dimension_numbers<[1], [0], [0], [1], [0, 0, 1, 1], [], []>} : vector<8x32xf32>, vector<32x128xf32>, vector<8x128xf32> -> vector<8x128xf32>
    %c0_3 = arith.constant 0 : index
    %c0_4 = arith.constant 0 : index
    %3 = vector.load %arg2[%c0_3, %c0_4] : memref<8x12xf32, #tpu.memory_space<vmem>>, vector<8x12xf32>
    %c0_5 = arith.constant 0 : index
    %c0_6 = arith.constant 0 : index
    %4 = vector.load %arg5[%c0_5, %c0_6] : memref<12x128xf32, #tpu.memory_space<vmem>>, vector<12x128xf32>
    %5 = vector.extract_strided_slice %3 {offsets = [0, 0], sizes = [8, 1], strides = [1, 1]} : vector<8x12xf32> to vector<8x1xf32>
    %6 = vector.extract_strided_slice %4 {offsets = [0, 0], sizes = [1, 128], strides = [1, 1]} : vector<12x128xf32> to vector<1x128xf32>
    %7 = vector.broadcast %5 : vector<8x1xf32> to vector<8x128xf32>
    %8 = vector.broadcast %6 : vector<1x128xf32> to vector<8x128xf32>
    %9 = arith.mulf %7, %8 : vector<8x128xf32>
    %10 = vector.extract_strided_slice %3 {offsets = [0, 1], sizes = [8, 1], strides = [1, 1]} : vector<8x12xf32> to vector<8x1xf32>
    %11 = vector.extract_strided_slice %4 {offsets = [1, 0], sizes = [1, 128], strides = [1, 1]} : vector<12x128xf32> to vector<1x128xf32>
    %12 = vector.broadcast %10 : vector<8x1xf32> to vector<8x128xf32>
    %13 = vector.broadcast %11 : vector<1x128xf32> to vector<8x128xf32>
    %14 = arith.mulf %12, %13 : vector<8x128xf32>
    %15 = arith.addf %9, %14 : vector<8x128xf32>
    %16 = vector.extract_strided_slice %3 {offsets = [0, 2], sizes = [8, 1], strides = [1, 1]} : vector<8x12xf32> to vector<8x1xf32>
    %17 = vector.extract_strided_slice %4 {offsets = [2, 0], sizes = [1, 128], strides = [1, 1]} : vector<12x128xf32> to vector<1x128xf32>
    %18 = vector.broadcast %16 : vector<8x1xf32> to vector<8x128xf32>
    %19 = vector.broadcast %17 : vector<1x128xf32> to vector<8x128xf32>
    %20 = arith.mulf %18, %19 : vector<8x128xf32>
    %21 = arith.addf %15, %20 : vector<8x128xf32>
    %22 = vector.extract_strided_slice %3 {offsets = [0, 3], sizes = [8, 1], strides = [1, 1]} : vector<8x12xf32> to vector<8x1xf32>
    %23 = vector.extract_strided_slice %4 {offsets = [3, 0], sizes = [1, 128], strides = [1, 1]} : vector<12x128xf32> to vector<1x128xf32>
    %24 = vector.broadcast %22 : vector<8x1xf32> to vector<8x128xf32>
    %25 = vector.broadcast %23 : vector<1x128xf32> to vector<8x128xf32>
    %26 = arith.mulf %24, %25 : vector<8x128xf32>
    %27 = arith.addf %21, %26 : vector<8x128xf32>
    %28 = vector.extract_strided_slice %3 {offsets = [0, 4], sizes = [8, 1], strides = [1, 1]} : vector<8x12xf32> to vector<8x1xf32>
    %29 = vector.extract_strided_slice %4 {offsets = [4, 0], sizes = [1, 128], strides = [1, 1]} : vector<12x128xf32> to vector<1x128xf32>
    %30 = vector.broadcast %28 : vector<8x1xf32> to vector<8x128xf32>
    %31 = vector.broadcast %29 : vector<1x128xf32> to vector<8x128xf32>
    %32 = arith.mulf %30, %31 : vector<8x128xf32>
    %33 = arith.addf %27, %32 : vector<8x128xf32>
    %34 = vector.extract_strided_slice %3 {offsets = [0, 5], sizes = [8, 1], strides = [1, 1]} : vector<8x12xf32> to vector<8x1xf32>
    %35 = vector.extract_strided_slice %4 {offsets = [5, 0], sizes = [1, 128], strides = [1, 1]} : vector<12x128xf32> to vector<1x128xf32>
    %36 = vector.broadcast %34 : vector<8x1xf32> to vector<8x128xf32>
    %37 = vector.broadcast %35 : vector<1x128xf32> to vector<8x128xf32>
    %38 = arith.mulf %36, %37 : vector<8x128xf32>
    %39 = arith.addf %33, %38 : vector<8x128xf32>
    %40 = vector.extract_strided_slice %3 {offsets = [0, 6], sizes = [8, 1], strides = [1, 1]} : vector<8x12xf32> to vector<8x1xf32>
    %41 = vector.extract_strided_slice %4 {offsets = [6, 0], sizes = [1, 128], strides = [1, 1]} : vector<12x128xf32> to vector<1x128xf32>
    %42 = vector.broadcast %40 : vector<8x1xf32> to vector<8x128xf32>
    %43 = vector.broadcast %41 : vector<1x128xf32> to vector<8x128xf32>
    %44 = arith.mulf %42, %43 : vector<8x128xf32>
    %45 = arith.addf %39, %44 : vector<8x128xf32>
    %46 = vector.extract_strided_slice %3 {offsets = [0, 7], sizes = [8, 1], strides = [1, 1]} : vector<8x12xf32> to vector<8x1xf32>
    %47 = vector.extract_strided_slice %4 {offsets = [7, 0], sizes = [1, 128], strides = [1, 1]} : vector<12x128xf32> to vector<1x128xf32>
    %48 = vector.broadcast %46 : vector<8x1xf32> to vector<8x128xf32>
    %49 = vector.broadcast %47 : vector<1x128xf32> to vector<8x128xf32>
    %50 = arith.mulf %48, %49 : vector<8x128xf32>
    %51 = arith.addf %45, %50 : vector<8x128xf32>
    %52 = vector.extract_strided_slice %3 {offsets = [0, 8], sizes = [8, 1], strides = [1, 1]} : vector<8x12xf32> to vector<8x1xf32>
    %53 = vector.extract_strided_slice %4 {offsets = [8, 0], sizes = [1, 128], strides = [1, 1]} : vector<12x128xf32> to vector<1x128xf32>
    %54 = vector.broadcast %52 : vector<8x1xf32> to vector<8x128xf32>
    %55 = vector.broadcast %53 : vector<1x128xf32> to vector<8x128xf32>
    %56 = arith.mulf %54, %55 : vector<8x128xf32>
    %57 = arith.addf %51, %56 : vector<8x128xf32>
    %58 = vector.extract_strided_slice %3 {offsets = [0, 9], sizes = [8, 1], strides = [1, 1]} : vector<8x12xf32> to vector<8x1xf32>
    %59 = vector.extract_strided_slice %4 {offsets = [9, 0], sizes = [1, 128], strides = [1, 1]} : vector<12x128xf32> to vector<1x128xf32>
    %60 = vector.broadcast %58 : vector<8x1xf32> to vector<8x128xf32>
    %61 = vector.broadcast %59 : vector<1x128xf32> to vector<8x128xf32>
    %62 = arith.mulf %60, %61 : vector<8x128xf32>
    %63 = arith.addf %57, %62 : vector<8x128xf32>
    %64 = vector.extract_strided_slice %3 {offsets = [0, 10], sizes = [8, 1], strides = [1, 1]} : vector<8x12xf32> to vector<8x1xf32>
    %65 = vector.extract_strided_slice %4 {offsets = [10, 0], sizes = [1, 128], strides = [1, 1]} : vector<12x128xf32> to vector<1x128xf32>
    %66 = vector.broadcast %64 : vector<8x1xf32> to vector<8x128xf32>
    %67 = vector.broadcast %65 : vector<1x128xf32> to vector<8x128xf32>
    %68 = arith.mulf %66, %67 : vector<8x128xf32>
    %69 = arith.addf %63, %68 : vector<8x128xf32>
    %70 = vector.extract_strided_slice %3 {offsets = [0, 11], sizes = [8, 1], strides = [1, 1]} : vector<8x12xf32> to vector<8x1xf32>
    %71 = vector.extract_strided_slice %4 {offsets = [11, 0], sizes = [1, 128], strides = [1, 1]} : vector<12x128xf32> to vector<1x128xf32>
    %72 = vector.broadcast %70 : vector<8x1xf32> to vector<8x128xf32>
    %73 = vector.broadcast %71 : vector<1x128xf32> to vector<8x128xf32>
    %74 = arith.mulf %72, %73 : vector<8x128xf32>
    %75 = arith.addf %69, %74 : vector<8x128xf32>
    %76 = arith.addf %2, %75 : vector<8x128xf32>
    %c0_7 = arith.constant 0 : index
    %c0_8 = arith.constant 0 : index
    %77 = vector.load %arg3[%c0_7, %c0_8] : memref<8x2xf32, #tpu.memory_space<vmem>>, vector<8x2xf32>
    %c0_9 = arith.constant 0 : index
    %c0_10 = arith.constant 0 : index
    %78 = vector.load %arg6[%c0_9, %c0_10] : memref<2x128xf32, #tpu.memory_space<vmem>>, vector<2x128xf32>
    %79 = vector.extract_strided_slice %77 {offsets = [0, 0], sizes = [8, 1], strides = [1, 1]} : vector<8x2xf32> to vector<8x1xf32>
    %80 = vector.extract_strided_slice %78 {offsets = [0, 0], sizes = [1, 128], strides = [1, 1]} : vector<2x128xf32> to vector<1x128xf32>
    %81 = vector.broadcast %79 : vector<8x1xf32> to vector<8x128xf32>
    %82 = vector.broadcast %80 : vector<1x128xf32> to vector<8x128xf32>
    %83 = arith.mulf %81, %82 : vector<8x128xf32>
    %84 = vector.extract_strided_slice %77 {offsets = [0, 1], sizes = [8, 1], strides = [1, 1]} : vector<8x2xf32> to vector<8x1xf32>
    %85 = vector.extract_strided_slice %78 {offsets = [1, 0], sizes = [1, 128], strides = [1, 1]} : vector<2x128xf32> to vector<1x128xf32>
    %86 = vector.broadcast %84 : vector<8x1xf32> to vector<8x128xf32>
    %87 = vector.broadcast %85 : vector<1x128xf32> to vector<8x128xf32>
    %88 = arith.mulf %86, %87 : vector<8x128xf32>
    %89 = arith.addf %83, %88 : vector<8x128xf32>
    %90 = arith.addf %76, %89 : vector<8x128xf32>
    %c0_11 = arith.constant 0 : index
    %c0_12 = arith.constant 0 : index
    %91 = vector.load %arg7[%c0_11, %c0_12] : memref<1x128xf32, #tpu.memory_space<vmem>>, vector<1x128xf32>
    %92 = vector.broadcast %91 : vector<1x128xf32> to vector<8x128xf32>
    %93 = arith.addf %90, %92 : vector<8x128xf32>
    %cst_13 = arith.constant 0.000000e+00 : f32
    %94 = vector.broadcast %cst_13 : f32 to vector<8x128xf32>
    %95 = arith.cmpf oge, %93, %94 : vector<8x128xf32>
    %cst_14 = arith.constant 1.000000e-01 : f32
    %96 = vector.broadcast %cst_14 : f32 to vector<8x128xf32>
    %97 = arith.mulf %96, %93 : vector<8x128xf32>
    %98 = arith.select %95, %93, %97 : vector<8x128xi1>, vector<8x128xf32>
    %c0_15 = arith.constant 0 : index
    %c0_16 = arith.constant 0 : index
    %99 = vector.load %arg8[%c0_15, %c0_16] : memref<128x128xf32, #tpu.memory_space<vmem>>, vector<128x128xf32>
    %c0_17 = arith.constant 0 : index
    %c0_18 = arith.constant 0 : index
    %100 = vector.load %arg9[%c0_17, %c0_18] : memref<1x128xf32, #tpu.memory_space<vmem>>, vector<1x128xf32>
    %cst_19 = arith.constant dense<0.000000e+00> : vector<8x128xf32>
    %101 = tpu.matmul %98, %99, %cst_19 {dimension_numbers = #tpu.dot_dimension_numbers<[1], [0], [0], [1], [0, 0, 1, 1], [], []>} : vector<8x128xf32>, vector<128x128xf32>, vector<8x128xf32> -> vector<8x128xf32>
    %102 = vector.broadcast %100 : vector<1x128xf32> to vector<8x128xf32>
    %103 = arith.addf %101, %102 : vector<8x128xf32>
    %cst_20 = arith.constant 0.000000e+00 : f32
    %104 = vector.broadcast %cst_20 : f32 to vector<8x128xf32>
    %105 = arith.cmpf oge, %103, %104 : vector<8x128xf32>
    %cst_21 = arith.constant 1.000000e-01 : f32
    %106 = vector.broadcast %cst_21 : f32 to vector<8x128xf32>
    %107 = arith.mulf %106, %103 : vector<8x128xf32>
    %108 = arith.select %105, %103, %107 : vector<8x128xi1>, vector<8x128xf32>
    %c0_22 = arith.constant 0 : index
    %c0_23 = arith.constant 0 : index
    %109 = vector.load %arg10[%c0_22, %c0_23] : memref<128x1xf32, #tpu.memory_space<vmem>>, vector<128x1xf32>
    %c0_24 = arith.constant 0 : index
    %c0_25 = arith.constant 0 : index
    %110 = vector.load %arg11[%c0_24, %c0_25] : memref<1x1xf32, #tpu.memory_space<vmem>>, vector<1x1xf32>
    %cst_26 = arith.constant dense<0.000000e+00> : vector<8x1xf32>
    %111 = tpu.matmul %108, %109, %cst_26 {dimension_numbers = #tpu.dot_dimension_numbers<[1], [0], [0], [1], [0, 0, 1, 1], [], []>} : vector<8x128xf32>, vector<128x1xf32>, vector<8x1xf32> -> vector<8x1xf32>
    %112 = vector.broadcast %110 : vector<1x1xf32> to vector<8x1xf32>
    %113 = arith.addf %111, %112 : vector<8x1xf32>
    %c0_27 = arith.constant 0 : index
    %c0_28 = arith.constant 0 : index
    %114 = vector.load %arg12[%c0_27, %c0_28] : memref<8x1xf32, #tpu.memory_space<vmem>>, vector<8x1xf32>
    tpu.vector_store %arg12[%c0_27, %c0_28], %113 {strides = array<i32>} : memref<8x1xf32, #tpu.memory_space<vmem>>, vector<8x1xf32>,
    return
  }
  func.func @transform_0(%arg0: i32) -> (i32, i32) {
    %c0_i32 = arith.constant 0 : i32
    %c0_i32_0 = arith.constant 0 : i32
    return %arg0, %c0_i32 : i32, i32
  }
  func.func @transform_1(%arg0: i32) -> (i32, i32) {
    %c0_i32 = arith.constant 0 : i32
    %c0_i32_0 = arith.constant 0 : i32
    return %arg0, %c0_i32 : i32, i32
  }
  func.func @transform_2(%arg0: i32) -> (i32, i32) {
    %c0_i32 = arith.constant 0 : i32
    %c0_i32_0 = arith.constant 0 : i32
    return %arg0, %c0_i32 : i32, i32
  }
  func.func @transform_3(%arg0: i32) -> (i32, i32) {
    %c0_i32 = arith.constant 0 : i32
    %c0_i32_0 = arith.constant 0 : i32
    %c0_i32_1 = arith.constant 0 : i32
    return %c0_i32, %c0_i32_0 : i32, i32
  }
  func.func @transform_4(%arg0: i32) -> (i32, i32) {
    %c0_i32 = arith.constant 0 : i32
    %c0_i32_0 = arith.constant 0 : i32
    %c0_i32_1 = arith.constant 0 : i32
    return %c0_i32, %c0_i32_0 : i32, i32
  }
  func.func @transform_5(%arg0: i32) -> (i32, i32) {
    %c0_i32 = arith.constant 0 : i32
    %c0_i32_0 = arith.constant 0 : i32
    %c0_i32_1 = arith.constant 0 : i32
    return %c0_i32, %c0_i32_0 : i32, i32
  }
  func.func @transform_6(%arg0: i32) -> (i32, i32) {
    %c0_i32 = arith.constant 0 : i32
    %c0_i32_0 = arith.constant 0 : i32
    %c0_i32_1 = arith.constant 0 : i32
    return %c0_i32, %c0_i32_0 : i32, i32
  }
  func.func @transform_7(%arg0: i32) -> (i32, i32) {
    %c0_i32 = arith.constant 0 : i32
    %c0_i32_0 = arith.constant 0 : i32
    %c0_i32_1 = arith.constant 0 : i32
    return %c0_i32, %c0_i32_0 : i32, i32
  }
  func.func @transform_8(%arg0: i32) -> (i32, i32) {
    %c0_i32 = arith.constant 0 : i32
    %c0_i32_0 = arith.constant 0 : i32
    %c0_i32_1 = arith.constant 0 : i32
    return %c0_i32, %c0_i32_0 : i32, i32
  }
  func.func @transform_9(%arg0: i32) -> (i32, i32) {
    %c0_i32 = arith.constant 0 : i32
    %c0_i32_0 = arith.constant 0 : i32
    %c0_i32_1 = arith.constant 0 : i32
    return %c0_i32, %c0_i32_0 : i32, i32
  }
  func.func @transform_10(%arg0: i32) -> (i32, i32) {
    %c0_i32 = arith.constant 0 : i32
    %c0_i32_0 = arith.constant 0 : i32
    %c0_i32_1 = arith.constant 0 : i32
    return %c0_i32, %c0_i32_0 : i32, i32
  }
  func.func @transform_11(%arg0: i32) -> (i32, i32) {
    %c0_i32 = arith.constant 0 : i32
    %c0_i32_0 = arith.constant 0 : i32
    return %arg0, %c0_i32 : i32, i32
  }
}

module attributes {stable_mosaic.version = 11 : i64} {
  func.func @kernel(%arg0: i32, %arg1: memref<8x32xf32, #tpu.memory_space<vmem>>, %arg2: memref<8x12xf32, #tpu.memory_space<vmem>>, %arg3: memref<8x2xf32, #tpu.memory_space<vmem>>, %arg4: memref<32x128xf32, #tpu.memory_space<vmem>>, %arg5: memref<12x128xf32, #tpu.memory_space<vmem>>, %arg6: memref<2x128xf32, #tpu.memory_space<vmem>>, %arg7: memref<1x128xf32, #tpu.memory_space<vmem>>, %arg8: memref<128x128xf32, #tpu.memory_space<vmem>>, %arg9: memref<1x128xf32, #tpu.memory_space<vmem>>, %arg10: memref<128x1xf32, #tpu.memory_space<vmem>>, %arg11: memref<1x1xf32, #tpu.memory_space<vmem>>, %arg12: memref<8x1xf32, #tpu.memory_space<vmem>>) attributes {dimension_semantics = [#tpu.dimension_semantics<parallel>], iteration_bounds = array<i64: 1>, scalar_prefetch = 0 : i64, scratch_operands = 0 : i64, tpu.core_type = #tpu.core_type<tc>, window_params = [{transform_indices = @transform_0, window_bounds = array<i64: 8, 32>}, {transform_indices = @transform_1, window_bounds = array<i64: 8, 12>}, {transform_indices = @transform_2, window_bounds = array<i64: 8, 2>}, {pipeline_mode = #tpu.pipeline_mode<synchronous>, transform_indices = @transform_3, window_bounds = array<i64: 32, 128>}, {pipeline_mode = #tpu.pipeline_mode<synchronous>, transform_indices = @transform_4, window_bounds = array<i64: 12, 128>}, {pipeline_mode = #tpu.pipeline_mode<synchronous>, transform_indices = @transform_5, window_bounds = array<i64: 2, 128>}, {pipeline_mode = #tpu.pipeline_mode<synchronous>, transform_indices = @transform_6, window_bounds = array<i64: 1, 128>}, {pipeline_mode = #tpu.pipeline_mode<synchronous>, transform_indices = @transform_7, window_bounds = array<i64: 128, 128>}, {pipeline_mode = #tpu.pipeline_mode<synchronous>, transform_indices = @transform_8, window_bounds = array<i64: 1, 128>}, {pipeline_mode = #tpu.pipeline_mode<synchronous>, transform_indices = @transform_9, window_bounds = array<i64: 128, 1>}, {pipeline_mode = #tpu.pipeline_mode<synchronous>, transform_indices = @transform_10, window_bounds = array<i64: 1, 1>}, {transform_indices = @transform_11, window_bounds = array<i64: 8, 1>}]} {
    %c0 = arith.constant 0 : index
    %c0_0 = arith.constant 0 : index
    %0 = vector.load %arg1[%c0, %c0_0] : memref<8x32xf32, #tpu.memory_space<vmem>>, vector<8x32xf32>
    %c0_1 = arith.constant 0 : index
    %c0_2 = arith.constant 0 : index
    %1 = vector.load %arg4[%c0_1, %c0_2] : memref<32x128xf32, #tpu.memory_space<vmem>>, vector<32x128xf32>
    %cst = arith.constant dense<0.000000e+00> : vector<8x128xf32>
    %2 = tpu.matmul %0, %1, %cst {dimension_numbers = #tpu.dot_dimension_numbers<[1], [0], [0], [1], [0, 0, 1, 1], [], []>} : vector<8x32xf32>, vector<32x128xf32>, vector<8x128xf32> -> vector<8x128xf32>
    %c0_3 = arith.constant 0 : index
    %c0_4 = arith.constant 0 : index
    %3 = vector.load %arg2[%c0_3, %c0_4] : memref<8x12xf32, #tpu.memory_space<vmem>>, vector<8x12xf32>
    %c0_5 = arith.constant 0 : index
    %c0_6 = arith.constant 0 : index
    %4 = vector.load %arg5[%c0_5, %c0_6] : memref<12x128xf32, #tpu.memory_space<vmem>>, vector<12x128xf32>
    %5 = vector.extract_strided_slice %3 {offsets = [0, 0], sizes = [8, 1], strides = [1, 1]} : vector<8x12xf32> to vector<8x1xf32>
    %6 = vector.extract_strided_slice %4 {offsets = [0, 0], sizes = [1, 128], strides = [1, 1]} : vector<12x128xf32> to vector<1x128xf32>
    %7 = vector.broadcast %5 : vector<8x1xf32> to vector<8x128xf32>
    %8 = vector.broadcast %6 : vector<1x128xf32> to vector<8x128xf32>
    %9 = arith.mulf %7, %8 : vector<8x128xf32>
    %10 = vector.extract_strided_slice %3 {offsets = [0, 1], sizes = [8, 1], strides = [1, 1]} : vector<8x12xf32> to vector<8x1xf32>
    %11 = vector.extract_strided_slice %4 {offsets = [1, 0], sizes = [1, 128], strides = [1, 1]} : vector<12x128xf32> to vector<1x128xf32>
    %12 = vector.broadcast %10 : vector<8x1xf32> to vector<8x128xf32>
    %13 = vector.broadcast %11 : vector<1x128xf32> to vector<8x128xf32>
    %14 = arith.mulf %12, %13 : vector<8x128xf32>
    %15 = arith.addf %9, %14 : vector<8x128xf32>
    %16 = vector.extract_strided_slice %3 {offsets = [0, 2], sizes = [8, 1], strides = [1, 1]} : vector<8x12xf32> to vector<8x1xf32>
    %17 = vector.extract_strided_slice %4 {offsets = [2, 0], sizes = [1, 128], strides = [1, 1]} : vector<12x128xf32> to vector<1x128xf32>
    %18 = vector.broadcast %16 : vector<8x1xf32> to vector<8x128xf32>
    %19 = vector.broadcast %17 : vector<1x128xf32> to vector<8x128xf32>
    %20 = arith.mulf %18, %19 : vector<8x128xf32>
    %21 = arith.addf %15, %20 : vector<8x128xf32>
    %22 = vector.extract_strided_slice %3 {offsets = [0, 3], sizes = [8, 1], strides = [1, 1]} : vector<8x12xf32> to vector<8x1xf32>
    %23 = vector.extract_strided_slice %4 {offsets = [3, 0], sizes = [1, 128], strides = [1, 1]} : vector<12x128xf32> to vector<1x128xf32>
    %24 = vector.broadcast %22 : vector<8x1xf32> to vector<8x128xf32>
    %25 = vector.broadcast %23 : vector<1x128xf32> to vector<8x128xf32>
    %26 = arith.mulf %24, %25 : vector<8x128xf32>
    %27 = arith.addf %21, %26 : vector<8x128xf32>
    %28 = vector.extract_strided_slice %3 {offsets = [0, 4], sizes = [8, 1], strides = [1, 1]} : vector<8x12xf32> to vector<8x1xf32>
    %29 = vector.extract_strided_slice %4 {offsets = [4, 0], sizes = [1, 128], strides = [1, 1]} : vector<12x128xf32> to vector<1x128xf32>
    %30 = vector.broadcast %28 : vector<8x1xf32> to vector<8x128xf32>
    %31 = vector.broadcast %29 : vector<1x128xf32> to vector<8x128xf32>
    %32 = arith.mulf %30, %31 : vector<8x128xf32>
    %33 = arith.addf %27, %32 : vector<8x128xf32>
    %34 = vector.extract_strided_slice %3 {offsets = [0, 5], sizes = [8, 1], strides = [1, 1]} : vector<8x12xf32> to vector<8x1xf32>
    %35 = vector.extract_strided_slice %4 {offsets = [5, 0], sizes = [1, 128], strides = [1, 1]} : vector<12x128xf32> to vector<1x128xf32>
    %36 = vector.broadcast %34 : vector<8x1xf32> to vector<8x128xf32>
    %37 = vector.broadcast %35 : vector<1x128xf32> to vector<8x128xf32>
    %38 = arith.mulf %36, %37 : vector<8x128xf32>
    %39 = arith.addf %33, %38 : vector<8x128xf32>
    %40 = vector.extract_strided_slice %3 {offsets = [0, 6], sizes = [8, 1], strides = [1, 1]} : vector<8x12xf32> to vector<8x1xf32>
    %41 = vector.extract_strided_slice %4 {offsets = [6, 0], sizes = [1, 128], strides = [1, 1]} : vector<12x128xf32> to vector<1x128xf32>
    %42 = vector.broadcast %40 : vector<8x1xf32> to vector<8x128xf32>
    %43 = vector.broadcast %41 : vector<1x128xf32> to vector<8x128xf32>
    %44 = arith.mulf %42, %43 : vector<8x128xf32>
    %45 = arith.addf %39, %44 : vector<8x128xf32>
    %46 = vector.extract_strided_slice %3 {offsets = [0, 7], sizes = [8, 1], strides = [1, 1]} : vector<8x12xf32> to vector<8x1xf32>
    %47 = vector.extract_strided_slice %4 {offsets = [7, 0], sizes = [1, 128], strides = [1, 1]} : vector<12x128xf32> to vector<1x128xf32>
    %48 = vector.broadcast %46 : vector<8x1xf32> to vector<8x128xf32>
    %49 = vector.broadcast %47 : vector<1x128xf32> to vector<8x128xf32>
    %50 = arith.mulf %48, %49 : vector<8x128xf32>
    %51 = arith.addf %45, %50 : vector<8x128xf32>
    %52 = vector.extract_strided_slice %3 {offsets = [0, 8], sizes = [8, 1], strides = [1, 1]} : vector<8x12xf32> to vector<8x1xf32>
    %53 = vector.extract_strided_slice %4 {offsets = [8, 0], sizes = [1, 128], strides = [1, 1]} : vector<12x128xf32> to vector<1x128xf32>
    %54 = vector.broadcast %52 : vector<8x1xf32> to vector<8x128xf32>
    %55 = vector.broadcast %53 : vector<1x128xf32> to vector<8x128xf32>
    %56 = arith.mulf %54, %55 : vector<8x128xf32>
    %57 = arith.addf %51, %56 : vector<8x128xf32>
    %58 = vector.extract_strided_slice %3 {offsets = [0, 9], sizes = [8, 1], strides = [1, 1]} : vector<8x12xf32> to vector<8x1xf32>
    %59 = vector.extract_strided_slice %4 {offsets = [9, 0], sizes = [1, 128], strides = [1, 1]} : vector<12x128xf32> to vector<1x128xf32>
    %60 = vector.broadcast %58 : vector<8x1xf32> to vector<8x128xf32>
    %61 = vector.broadcast %59 : vector<1x128xf32> to vector<8x128xf32>
    %62 = arith.mulf %60, %61 : vector<8x128xf32>
    %63 = arith.addf %57, %62 : vector<8x128xf32>
    %64 = vector.extract_strided_slice %3 {offsets = [0, 10], sizes = [8, 1], strides = [1, 1]} : vector<8x12xf32> to vector<8x1xf32>
    %65 = vector.extract_strided_slice %4 {offsets = [10, 0], sizes = [1, 128], strides = [1, 1]} : vector<12x128xf32> to vector<1x128xf32>
    %66 = vector.broadcast %64 : vector<8x1xf32> to vector<8x128xf32>
    %67 = vector.broadcast %65 : vector<1x128xf32> to vector<8x128xf32>
    %68 = arith.mulf %66, %67 : vector<8x128xf32>
    %69 = arith.addf %63, %68 : vector<8x128xf32>
    %70 = vector.extract_strided_slice %3 {offsets = [0, 11], sizes = [8, 1], strides = [1, 1]} : vector<8x12xf32> to vector<8x1xf32>
    %71 = vector.extract_strided_slice %4 {offsets = [11, 0], sizes = [1, 128], strides = [1, 1]} : vector<12x128xf32> to vector<1x128xf32>
    %72 = vector.broadcast %70 : vector<8x1xf32> to vector<8x128xf32>
    %73 = vector.broadcast %71 : vector<1x128xf32> to vector<8x128xf32>
    %74 = arith.mulf %72, %73 : vector<8x128xf32>
    %75 = arith.addf %69, %74 : vector<8x128xf32>
    %76 = arith.addf %2, %75 : vector<8x128xf32>
    %c0_7 = arith.constant 0 : index
    %c0_8 = arith.constant 0 : index
    %77 = vector.load %arg3[%c0_7, %c0_8] : memref<8x2xf32, #tpu.memory_space<vmem>>, vector<8x2xf32>
    %c0_9 = arith.constant 0 : index
    %c0_10 = arith.constant 0 : index
    %78 = vector.load %arg6[%c0_9, %c0_10] : memref<2x128xf32, #tpu.memory_space<vmem>>, vector<2x128xf32>
    %79 = vector.extract_strided_slice %77 {offsets = [0, 0], sizes = [8, 1], strides = [1, 1]} : vector<8x2xf32> to vector<8x1xf32>
    %80 = vector.extract_strided_slice %78 {offsets = [0, 0], sizes = [1, 128], strides = [1, 1]} : vector<2x128xf32> to vector<1x128xf32>
    %81 = vector.broadcast %79 : vector<8x1xf32> to vector<8x128xf32>
    %82 = vector.broadcast %80 : vector<1x128xf32> to vector<8x128xf32>
    %83 = arith.mulf %81, %82 : vector<8x128xf32>
    %84 = vector.extract_strided_slice %77 {offsets = [0, 1], sizes = [8, 1], strides = [1, 1]} : vector<8x2xf32> to vector<8x1xf32>
    %85 = vector.extract_strided_slice %78 {offsets = [1, 0], sizes = [1, 128], strides = [1, 1]} : vector<2x128xf32> to vector<1x128xf32>
    %86 = vector.broadcast %84 : vector<8x1xf32> to vector<8x128xf32>
    %87 = vector.broadcast %85 : vector<1x128xf32> to vector<8x128xf32>
    %88 = arith.mulf %86, %87 : vector<8x128xf32>
    %89 = arith.addf %83, %88 : vector<8x128xf32>
    %90 = arith.addf %76, %89 : vector<8x128xf32>
    %c0_11 = arith.constant 0 : index
    %c0_12 = arith.constant 0 : index
    %91 = vector.load %arg7[%c0_11, %c0_12] : memref<1x128xf32, #tpu.memory_space<vmem>>, vector<1x128xf32>
    %92 = vector.broadcast %91 : vector<1x128xf32> to vector<8x128xf32>
    %93 = arith.addf %90, %92 : vector<8x128xf32>
    %cst_13 = arith.constant 0.000000e+00 : f32
    %94 = vector.broadcast %cst_13 : f32 to vector<8x128xf32>
    %95 = arith.cmpf oge, %93, %94 : vector<8x128xf32>
    %cst_14 = arith.constant 1.000000e-01 : f32
    %96 = vector.broadcast %cst_14 : f32 to vector<8x128xf32>
    %97 = arith.mulf %96, %93 : vector<8x128xf32>
    %98 = arith.select %95, %93, %97 : vector<8x128xi1>, vector<8x128xf32>
    %c0_15 = arith.constant 0 : index
    %c0_16 = arith.constant 0 : index
    %99 = vector.load %arg8[%c0_15, %c0_16] : memref<128x128xf32, #tpu.memory_space<vmem>>, vector<128x128xf32>
    %c0_17 = arith.constant 0 : index
    %c0_18 = arith.constant 0 : index
    %100 = vector.load %arg9[%c0_17, %c0_18] : memref<1x128xf32, #tpu.memory_space<vmem>>, vector<1x128xf32>
    %cst_19 = arith.constant dense<0.000000e+00> : vector<8x128xf32>
    %101 = tpu.matmul %98, %99, %cst_19 {dimension_numbers = #tpu.dot_dimension_numbers<[1], [0], [0], [1], [0, 0, 1, 1], [], []>} : vector<8x128xf32>, vector<128x128xf32>, vector<8x128xf32> -> vector<8x128xf32>
    %102 = vector.broadcast %100 : vector<1x128xf32> to vector<8x128xf32>
    %103 = arith.addf %101, %102 : vector<8x128xf32>
    %cst_20 = arith.constant 0.000000e+00 : f32
    %104 = vector.broadcast %cst_20 : f32 to vector<8x128xf32>
    %105 = arith.cmpf oge, %103, %104 : vector<8x128xf32>
    %cst_21 = arith.constant 1.000000e-01 : f32
    %106 = vector.broadcast %cst_21 : f32 to vector<8x128xf32>
    %107 = arith.mulf %106, %103 : vector<8x128xf32>
    %108 = arith.select %105, %103, %107 : vector<8x128xi1>, vector<8x128xf32>
    %c0_22 = arith.constant 0 : index
    %c0_23 = arith.constant 0 : index
    %109 = vector.load %arg10[%c0_22, %c0_23] : memref<128x1xf32, #tpu.memory_space<vmem>>, vector<128x1xf32>
    %c0_24 = arith.constant 0 : index
    %c0_25 = arith.constant 0 : index
    %110 = vector.load %arg11[%c0_24, %c0_25] : memref<1x1xf32, #tpu.memory_space<vmem>>, vector<1x1xf32>
    %cst_26 = arith.constant dense<0.000000e+00> : vector<8x1xf32>
    %111 = tpu.matmul %108, %109, %cst_26 {dimension_numbers = #tpu.dot_dimension_numbers<[1], [0], [0], [1], [0, 0, 1, 1], [], []>} : vector<8x128xf32>, vector<128x1xf32>, vector<8x1xf32> -> vector<8x1xf32>
    %112 = vector.broadcast %110 : vector<1x1xf32> to vector<8x1xf32>
    %113 = arith.addf %111, %112 : vector<8x1xf32>
    %c0_27 = arith.constant 0 : index
    %c0_28 = arith.constant 0 : index
    %114 = vector.load %arg12[%c0_27, %c0_28] : memref<8x1xf32, #tpu.memory_space<vmem>>, vector<8x1xf32>
    tpu.vector_store %arg12[%c0_27, %c0_28], %113 {strides = array<i32>} : memref<8x1xf32, #tpu.memory_space<vmem>>, vector<8x1xf32>,
    return
  }
  func.func @transform_0(%arg0: i32) -> (i32, i32) {
    %c0_i32 = arith.constant 0 : i32
    %c0_i32_0 = arith.constant 0 : i32
    return %arg0, %c0_i32 : i32, i32
  }
  func.func @transform_1(%arg0: i32) -> (i32, i32) {
    %c0_i32 = arith.constant 0 : i32
    %c0_i32_0 = arith.constant 0 : i32
    return %arg0, %c0_i32 : i32, i32
  }
  func.func @transform_2(%arg0: i32) -> (i32, i32) {
    %c0_i32 = arith.constant 0 : i32
    %c0_i32_0 = arith.constant 0 : i32
    return %arg0, %c0_i32 : i32, i32
  }
  func.func @transform_3(%arg0: i32) -> (i32, i32) {
    %c0_i32 = arith.constant 0 : i32
    %c0_i32_0 = arith.constant 0 : i32
    %c0_i32_1 = arith.constant 0 : i32
    return %c0_i32, %c0_i32_0 : i32, i32
  }
  func.func @transform_4(%arg0: i32) -> (i32, i32) {
    %c0_i32 = arith.constant 0 : i32
    %c0_i32_0 = arith.constant 0 : i32
    %c0_i32_1 = arith.constant 0 : i32
    return %c0_i32, %c0_i32_0 : i32, i32
  }
  func.func @transform_5(%arg0: i32) -> (i32, i32) {
    %c0_i32 = arith.constant 0 : i32
    %c0_i32_0 = arith.constant 0 : i32
    %c0_i32_1 = arith.constant 0 : i32
    return %c0_i32, %c0_i32_0 : i32, i32
  }
  func.func @transform_6(%arg0: i32) -> (i32, i32) {
    %c0_i32 = arith.constant 0 : i32
    %c0_i32_0 = arith.constant 0 : i32
    %c0_i32_1 = arith.constant 0 : i32
    return %c0_i32, %c0_i32_0 : i32, i32
  }
  func.func @transform_7(%arg0: i32) -> (i32, i32) {
    %c0_i32 = arith.constant 0 : i32
    %c0_i32_0 = arith.constant 0 : i32
    %c0_i32_1 = arith.constant 0 : i32
    return %c0_i32, %c0_i32_0 : i32, i32
  }
  func.func @transform_8(%arg0: i32) -> (i32, i32) {
    %c0_i32 = arith.constant 0 : i32
    %c0_i32_0 = arith.constant 0 : i32
    %c0_i32_1 = arith.constant 0 : i32
    return %c0_i32, %c0_i32_0 : i32, i32
  }
  func.func @transform_9(%arg0: i32) -> (i32, i32) {
    %c0_i32 = arith.constant 0 : i32
    %c0_i32_0 = arith.constant 0 : i32
    %c0_i32_1 = arith.constant 0 : i32
    return %c0_i32, %c0_i32_0 : i32, i32
  }
  func.func @transform_10(%arg0: i32) -> (i32, i32) {
    %c0_i32 = arith.constant 0 : i32
    %c0_i32_0 = arith.constant 0 : i32
    %c0_i32_1 = arith.constant 0 : i32
    return %c0_i32, %c0_i32_0 : i32, i32
  }
  func.func @transform_11(%arg0: i32) -> (i32, i32) {
    %c0_i32 = arith.constant 0 : i32
    %c0_i32_0 = arith.constant 0 : i32
    return %arg0, %c0_i32 : i32, i32
  }
}

</mosaic_0001>

<bundles_post_ra>
// kernel: tpu_custom_call.1
= control target key start
LH: loop header
LB: loop body
LE: loop exit
PB: predicated region body
PF: predicated region fallthrough
CT: control target
= control target key end

     0   :  { %s993_s0 = inlined_call_operand.vmem [shape: f32[2,32], index: 0, kind: input, shape index: {}]   ;;  %s994_s1 = inlined_call_operand.vmem [shape: f32[2,12], index: 1, kind: input, shape index: {}]   ;;  %s995_s2 = inlined_call_operand.vmem [shape: f32[2,2], index: 2, kind: input, shape index: {}]   ;;  %s996_s3 = inlined_call_operand.hbm [shape: f32[32,128], index: 3, kind: input, shape index: {}]   ;;  %s997_s4 = inlined_call_operand.vmem [shape: f32[12,128], index: 4, kind: input, shape index: {}]   ;;  %s998_s5 = inlined_call_operand.vmem [shape: f32[2,128], index: 5, kind: input, shape index: {}]   ;;  %s999_s6 = inlined_call_operand.vmem [shape: f32[1,128], index: 6, kind: input, shape index: {}]   ;;  %s1000_s7 = inlined_call_operand.vmem [shape: f32[128,128], index: 7, kind: input, shape index: {}]   ;;  %s1001_s8 = inlined_call_operand.vmem [shape: f32[1,128], index: 8, kind: input, shape index: {}]   ;;  %s1002_s9 = inlined_call_operand.vmem [shape: f32[128,1], index: 9, kind: input, shape index: {}]   ;;  %s1003_s10 = inlined_call_operand.<no memory space> [shape: f32[1,1], index: 10, kind: input, shape index: {}]   ;;  %s1004_s11 = inlined_call_operand.vmem [shape: f32[2,1], index: 11, kind: output, shape index: {}]  }
   0x1   :  { %v16_v0 = vstv %s1003_s10 }
   0x2   :  { %17 = vst [vmem:[#allocation2] sm:$0x1] %v16_v0 }
   0x3   :  { %18 = vsyncpa [#allocation4], 0  ;;  %s756_s19 = smov [#allocation3]   ;;  %s732_s23 = scalar_lea.hbm %s996_s3, 512 }
   0x4   :  { %s30_s20 = sshll.u32 %s756_s19, 4  ;;  %p733_p0 = scmp.ne.s32.totalorder %s996_s3, %s732_s23  ;;  %s31_s20 = int_to_ptr.vmem [resolvable:$true] %s30_s20 }
   0x5   :  { %p736_p1 = scmp.lt.u32.totalorder %s732_s23, %s996_s3 }
   0x7   :  { %p738_p2 = pnand %p736_p1, %p733_p0 }
   0x9   :  { %741 = shalt.err (!%p738_p2)
}
   0xa   :  { %s742_s10 = scalar_lea.vmem %s31_s20, 512  ;;  %p747_p4 = scmp.lt.s32.totalorder %s31_s20, %s31_s20 }
   0xb   :  { %p743_p3 = scmp.ne.s32.totalorder %s31_s20, %s742_s10  ;;  %p748_p5 = scmp.lt.s32.totalorder %s742_s10, %s742_s10 }
   0xd   :  { %p749_p6 = por %p748_p5, %p747_p4 }
   0xf   :  { %p750_p7 = pnand %p749_p6, %p743_p3 }
  0x11   :  { %753 = shalt.err (!%p750_p7)
}
  0x12   :  { %s757_s28 = smov 128   ;;  %s758_s29 = smov 8  }
  0x13   :  { %36 = dma.hbm_to_vmem [thread:$0]  %s996_s3, 512, %s31_s20, [#allocation4], %s757_s28, %s757_s28, %s758_s29  }
  0x14   :  { %754 = dma.done.wait [#allocation4], 512  }
  0x15   :  { %755 = vsyncadd [#allocation4], 4294966784  ;;  %v759_v1 = vmov 0.0|0.0   ;;  %vm760_vm0 = vmmov 0   ;;  %v761_v2 = vmov 0.0   ;;  %v762_v3 = vmov 2  }
  0x16   :  { %645 = vmatprep.subr.bf16.mxu0 %v759_v1  ;;  %572 = vmatprep.mubr.msk.f32.mxu0 %vm760_vm0, %v761_v2  ;;  %v763_v4 = vmov 0   ;;  %v55_v5 = vld [vmem:[#allocation3] sm:$0xff]  ;;  %v56_v6 = vld [vmem:[#allocation3 + $0x8] sm:$0xff]  ;;  %v57_v7 = vld [vmem:[#allocation3 + $0x10] sm:$0xff]  ;;  %v764_v12 = vmov 3   ;;  %v765_v13 = vmov 1  }
  0x17   :  { %719 = vset.pattern.permute.xlu1 %v762_v3  ;;  %717 = vset.pattern.permute.xlu0 %v763_v4  ;;  %v646_v8 = vpack.c.bf16 %v56_v6, %v55_v5  ;;  %v58_v9 = vld [vmem:[#allocation3 + $0x18] sm:$0xff]  ;;  %vm182_vm1 = vcmask 261120   ;;  %v766_v15 = vmov 4   ;;  %v767_v16 = vmov 5   ;;  %v291_v25 = vld [vmem:[%s1000_s7 + $0x8] sm:$0xff]  ;;  %v292_v26 = vld [vmem:[%s1000_s7 + $0x10] sm:$0xff] }
  0x18   :  { %651 = vmatprep.subr.bf16.mxu1 %v759_v1  ;;  %607 = vmatprep.mubr.msk.f32.mxu1 %vm760_vm0, %v761_v2  ;;  %v59_v10 = vld [vmem:[%s994_s1] sm:$0xff]  ;;  %v649_v11 = vpack.c.bf16 %v58_v9, %v57_v7  ;;  %v768_v17 = vmov 6   ;;  %v769_v18 = vmov 8   ;;  %v770_v19 = vmov 7   ;;  %v293_v28 = vld [vmem:[%s1000_s7 + $0x18] sm:$0xff]  ;;  %v295_v31 = vld [vmem:[%s1000_s7 + $0x28] sm:$0xff] }
  0x19   :  { %83 = vperm.xlu1 %719, %v59_v10   ;;  %64 = vperm.xlu0 %717, %v59_v10   ;;  %v54_v14 = vld [vmem:[%s993_s0] sm:$0xff]  ;;  %v771_v20 = vmov 11   ;;  %v772_v21 = vmov 9   ;;  %v773_v22 = vmov 10   ;;  %v655_v29 = vpack.c.bf16 %v293_v28, %v292_v26  ;;  %v296_v33 = vld [vmem:[%s1000_s7 + $0x30] sm:$0xff]  ;;  %v297_v34 = vld [vmem:[%s1000_s7 + $0x38] sm:$0xff] }
  0x1a   :  { %647 = vmatpush3.bf16.msra.mxu0 %v646_v8  ;;  %v256_v23 = vld [vmem:[%s995_s2] sm:$0xff]  ;;  %v661_v35 = vpack.c.bf16 %v297_v34, %v296_v33  ;;  %v299_v37 = vld [vmem:[%s1000_s7 + $0x48] sm:$0xff]  ;;  %v300_v39 = vld [vmem:[%s1000_s7 + $0x50] sm:$0xff]  ;;  %v67_v6 = vlaneseq  ;;  %vm479_vm4 = vcmask 7168  }
  0x1b   :  { %648 = vmatprep.subr.bf16.mxu0 %v759_v1  ;;  %v290_v24 = vld [vmem:[%s1000_s7] sm:$0xff]  ;;  %v301_v40 = vld [vmem:[%s1000_s7 + $0x58] sm:$0xff]  ;;  %v303_v43 = vld [vmem:[%s1000_s7 + $0x68] sm:$0xff] }
  0x1c   :  { %v652_v27 = vpack.c.bf16 %v291_v25, %v290_v24  ;;  %v294_v30 = vld [vmem:[%s1000_s7 + $0x20] sm:$0xff]  ;;  %v667_v41 = vpack.c.bf16 %v301_v40, %v300_v39  ;;  %v304_v45 = vld [vmem:[%s1000_s7 + $0x70] sm:$0xff]  ;;  %v305_v46 = vld [vmem:[%s1000_s7 + $0x78] sm:$0xff]  ;;  %v68_v7 = vshrl.u32 %v67_v6, 7 }
  0x1d   :  { %720 = vset.pattern.permute.xlu1 %v764_v12  ;;  %718 = vset.pattern.permute.xlu0 %v765_v13  ;;  %v658_v32 = vpack.c.bf16 %v295_v31, %v294_v30  ;;  %v298_v36 = vld [vmem:[%s1000_s7 + $0x40] sm:$0xff]  ;;  %v673_v47 = vpack.c.bf16 %v305_v46, %v304_v45  ;;  %v387_v49 = vld [vmem:[%s1002_s9 + $0x8] sm:$0xff]  ;;  %v388_v50 = vld [vmem:[%s1002_s9 + $0x10] sm:$0xff] }
  0x1e   :  { %650 = vmatpush3.bf16.msra.mxu0 %v649_v11  ;;  %93 = vperm.xlu1 %720, %v59_v10   ;;  %v664_v38 = vpack.c.bf16 %v299_v37, %v298_v36  ;;  %v302_v42 = vld [vmem:[%s1000_s7 + $0x60] sm:$0xff]  ;;  %v389_v52 = vld [vmem:[%s1002_s9 + $0x18] sm:$0xff]  ;;  %v391_v55 = vld [vmem:[%s1002_s9 + $0x28] sm:$0xff]  ;;  %v69_v9 = vsub.s32 0, %v68_v7  ;;  %v108_v24 = vsub.s32 4, %v68_v7  ;;  %v128_v33 = vsub.s32 6, %v68_v7 }
  0x1f   :  { %73 = vperm.xlu0 %718, %v59_v10   ;;  %675 = vmatprep.subr.bf16.mxu0 %v759_v1  ;;  %v670_v44 = vpack.c.bf16 %v303_v43, %v302_v42  ;;  %v386_v48 = vld [vmem:[%s1002_s9] sm:$0xff]  ;;  %v679_v53 = vpack.c.bf16 %v389_v52, %v388_v50  ;;  %v392_v57 = vld [vmem:[%s1002_s9 + $0x30] sm:$0xff]  ;;  %v393_v58 = vld [vmem:[%s1002_s9 + $0x38] sm:$0xff]  ;;  %v138_v39 = vsub.s32 7, %v68_v7 }
  0x20   :  { %653 = vmatpush3.bf16.msra.mxu1 %v652_v27  ;;  %v676_v51 = vpack.c.bf16 %v387_v49, %v386_v48  ;;  %v390_v54 = vld [vmem:[%s1002_s9 + $0x20] sm:$0xff]  ;;  %v685_v59 = vpack.c.bf16 %v393_v58, %v392_v57  ;;  %v395_v61 = vld [vmem:[%s1002_s9 + $0x48] sm:$0xff]  ;;  %v396_v63 = vld [vmem:[%s1002_s9 + $0x50] sm:$0xff] }
  0x21   :  { %573 = vmatmul.mubr.msk.f32.vlgmr.msra.gmra.mrb[0].mxu0 %vm182_vm1, %v54_v14  ;;  %654 = vmatprep.subr.bf16.mxu1 %v759_v1  ;;  %v682_v56 = vpack.c.bf16 %v391_v55, %v390_v54  ;;  %v394_v60 = vld [vmem:[%s1002_s9 + $0x40] sm:$0xff]  ;;  %v397_v0 = vld [vmem:[%s1002_s9 + $0x58] sm:$0xff] }
  0x22   :  { %721 = vset.pattern.permute.xlu1 %v766_v15  ;;  %642 = vmatprep.mubr.msk.f32.mxu0 %vm760_vm0, %v761_v2  ;;  %v688_v62 = vpack.c.bf16 %v395_v61, %v394_v60  ;;  %v691_v2 = vpack.c.bf16 %v397_v0, %v396_v63  ;;  %v398_v3 = vld [vmem:[%s1002_s9 + $0x60] sm:$0xff] }
  0x23   :  { %103 = vperm.xlu1 %721, %v59_v10   ;;  %722 = vset.pattern.permute.xlu0 %v767_v16  ;;  %v60_v11 = vld [vmem:[%s997_s4] sm:$0xff] }
  0x24   :  { %113 = vperm.xlu0 %722, %v59_v10   ;;  %656 = vmatpush3.bf16.msra.mxu1 %v655_v29  ;;  %v70_v14 = vrot.slane %v60_v11, %v69_v9  ;;  %v109_v28 = vrot.slane %v60_v11, %v108_v24  ;;  %v118_v29 = vsub.s32 5, %v68_v7  ;;  %v129_v37 = vrot.slane %v60_v11, %v128_v33  ;;  %v257_v58 = vld [vmem:[%s998_s5] sm:$0x3] }
  0x25   :  { %657 = vmatprep.subr.bf16.mxu1 %v759_v1  ;;  %677 = vmatpush3.bf16.msra.mxu0 %v676_v51  ;;  %v139_v43 = vrot.slane %v60_v11, %v138_v39  ;;  %v266_v63 = vrot.slane %v257_v58, %v69_v9 }
  0x26   :  { %678 = vmatprep.subr.bf16.mxu0 %v759_v1  ;;  %v119_v34 = vrot.slane %v60_v11, %v118_v29 }
  0x27   :  { %723 = vset.pattern.permute.xlu1 %v768_v17 }
  0x28   :  { %123 = vperm.xlu1 %723, %v59_v10   ;;  %725 = vset.pattern.permute.xlu0 %v769_v18 }
  0x29   :  { %143 = vperm.xlu0 %725, %v59_v10   ;;  %659 = vmatpush3.bf16.msra.mxu1 %v658_v32 }
  0x2a   :  { %660 = vmatprep.subr.bf16.mxu1 %v759_v1  ;;  %680 = vmatpush3.bf16.msra.mxu0 %v679_v53 }
  0x2b   :  { %681 = vmatprep.subr.bf16.mxu0 %v759_v1 }
  0x2c   :  { %724 = vset.pattern.permute.xlu1 %v770_v19 }
  0x2d   :  { %133 = vperm.xlu1 %724, %v59_v10   ;;  %728 = vset.pattern.permute.xlu0 %v771_v20  ;;  %v98_v20 = vsub.s32 3, %v68_v7 }
  0x2e   :  { %173 = vperm.xlu0 %728, %v59_v10   ;;  %662 = vmatpush3.bf16.msra.mxu1 %v661_v35 }
  0x2f   :  { %663 = vmatprep.subr.bf16.mxu1 %v759_v1  ;;  %683 = vmatpush3.bf16.msra.mxu0 %v682_v56 }
  0x30   :  { %684 = vmatprep.subr.bf16.mxu0 %v759_v1 }
  0x31   :  { %726 = vset.pattern.permute.xlu1 %v772_v21 }
  0x32   :  { %153 = vperm.xlu1 %726, %v59_v10   ;;  %731 = vset.pattern.permute.xlu0 %v765_v13 }
  0x33   :  { %665 = vmatpush3.bf16.msra.mxu1 %v664_v38  ;;  %686 = vmatpush3.bf16.msra.mxu0 %v685_v59 }
  0x34   :  { %666 = vmatprep.subr.bf16.mxu1 %v759_v1  ;;  %687 = vmatprep.subr.bf16.mxu0 %v759_v1 }
  0x36   :  { %727 = vset.pattern.permute.xlu1 %v773_v22  ;;  %v99_v22 = vrot.slane %v60_v11, %v98_v20 }
  0x37   :  { %163 = vperm.xlu1 %727, %v59_v10   ;;  %668 = vmatpush3.bf16.msra.mxu1 %v667_v41  ;;  %v78_v10 = vsub.s32 1, %v68_v7 }
  0x38   :  { %669 = vmatprep.subr.bf16.mxu1 %v759_v1  ;;  %689 = vmatpush3.bf16.msra.mxu0 %v688_v62 }
  0x39   :  { %690 = vmatprep.subr.bf16.mxu0 %v759_v1  ;;  %v79_v15 = vrot.slane %v60_v11, %v78_v10  ;;  %v275_v0 = vrot.slane %v257_v58, %v78_v10 }
  0x3b   :  { %729 = vset.pattern.permute.xlu1 %v763_v4  ;;  %671 = vmatpush3.bf16.msra.mxu1 %v670_v44  ;;  %v399_v4 = vld [vmem:[%s1002_s9 + $0x68] sm:$0xff] }
  0x3c   :  { %260 = vperm.xlu1 %729, %v256_v23   ;;  %672 = vmatprep.subr.bf16.mxu1 %v759_v1  ;;  %v694_v5 = vpack.c.bf16 %v399_v4, %v398_v3  ;;  %v61_v44 = vld [vmem:[%s997_s4 + $0x8] sm:$0xf] }
  0x3d   :  { %692 = vmatpush3.bf16.msra.mxu0 %v691_v2  ;;  %v149_v48 = vrot.slane %v61_v44, %v69_v9  ;;  %v159_v51 = vrot.slane %v61_v44, %v78_v10  ;;  %v179_v61 = vrot.slane %v61_v44, %v98_v20  ;;  %v400_v10 = vld [vmem:[%s1002_s9 + $0x70] sm:$0xff]  ;;  %v523_v20 = vld [vmem:[%s1001_s8] ss:$0 sm:$0xff] }
  0x3e   :  { %693 = vmatprep.subr.bf16.mxu0 %v759_v1 }
  0x3f   :  { %674 = vmatpush3.bf16.msra.mxu1 %v673_v47 }
  0x40   :  { %730 = vset.pattern.permute.xlu1 %v765_v13  ;;  %v88_v13 = vsub.s32 2, %v68_v7 }
  0x41   :  { %269 = vperm.xlu1 %730, %v256_v23   ;;  %695 = vmatpush3.bf16.msra.mxu0 %v694_v5 }
  0x42   :  { %696 = vmatprep.subr.bf16.mxu0 %v759_v1  ;;  %v89_v18 = vrot.slane %v60_v11, %v88_v13  ;;  %v169_v56 = vrot.slane %v61_v44, %v88_v13 }
  0x98   :  { %v65_v8 = vpop.permute.xlu0 %64  ;;  %v84_v12 = vpop.permute.xlu1 %83 }
  0x99   :  { %v71_v19 = vmul.f32 %v70_v14, %v65_v8  ;;  %v90_v1 = vmul.f32 %v89_v18, %v84_v12  ;;  %v522_v14 = vld [vmem:[%s999_s6] ss:$0 sm:$0xff]  ;;  %v401_v18 = vld [vmem:[%s1002_s9 + $0x78] sm:$0xff] }
  0x9d   :  { %v94_v17 = vpop.permute.xlu1 %93 }
  0x9e   :  { %v74_v16 = vpop.permute.xlu0 %73  ;;  %v100_v26 = vmul.f32 %v99_v22, %v94_v17 }
  0x9f   :  { %v80_v21 = vmul.f32 %v79_v15, %v74_v16 }
  0xa1   :  { %v81_v23 = vadd.f32 %v80_v21, %v71_v19  ;;  %v697_v19 = vpack.c.bf16 %v401_v18, %v400_v10 }
  0xa2   :  { %v104_v25 = vpop.permute.xlu1 %103 }
  0xa3   :  { %v91_v27 = vadd.f32 %v90_v1, %v81_v23  ;;  %v110_v32 = vmul.f32 %v109_v28, %v104_v25  ;;  %v114_v35 = vpop.permute.xlu0 %113  ;;  %698 = vmatpush3.bf16.msra.mxu0 %v697_v19  ;;  %v524_v25 = vld [vmem:[#allocation2] ss:$0 sm:$0xff] }
  0xa4   :  { %v120_v38 = vmul.f32 %v119_v34, %v114_v35 }
  0xa5   :  { %v101_v31 = vadd.f32 %v100_v26, %v91_v27 }
  0xa7   :  { %v124_v30 = vpop.permute.xlu1 %123  ;;  %v111_v36 = vadd.f32 %v110_v32, %v101_v31 }
  0xa8   :  { %v130_v41 = vmul.f32 %v129_v37, %v124_v30  ;;  %v144_v49 = vpop.permute.xlu0 %143 }
  0xa9   :  { %v121_v42 = vadd.f32 %v120_v38, %v111_v36  ;;  %v150_v52 = vmul.f32 %v149_v48, %v144_v49 }
  0xab   :  { %v131_v46 = vadd.f32 %v130_v41, %v121_v42 }
  0xac   :  { %v134_v40 = vpop.permute.xlu1 %133 }
  0xad   :  { %v140_v47 = vmul.f32 %v139_v43, %v134_v40  ;;  %v174_v62 = vpop.permute.xlu0 %173 }
  0xae   :  { %v180_v4 = vmul.f32 %v179_v61, %v174_v62 }
  0xaf   :  { %v141_v50 = vadd.f32 %v140_v47, %v131_v46 }
  0xb1   :  { %v154_v45 = vpop.permute.xlu1 %153  ;;  %v151_v55 = vadd.f32 %v150_v52, %v141_v50 }
  0xb2   :  { %v160_v54 = vmul.f32 %v159_v51, %v154_v45 }
  0xb4   :  { %v161_v59 = vadd.f32 %v160_v54, %v151_v55 }
  0xb6   :  { %v164_v53 = vpop.permute.xlu1 %163 }
  0xb7   :  { %v170_v60 = vmul.f32 %v169_v56, %v164_v53 }
  0xb9   :  { %v171_v3 = vadd.f32 %v170_v60, %v161_v59 }
  0xbb   :  { %v261_v57 = vpop.permute.xlu1 %260  ;;  %v181_v7 = vadd.f32 %v180_v4, %v171_v3 }
  0xbc   :  { %v267_v5 = vmul.f32 %v266_v63, %v261_v57 }
  0xc0   :  { %v270_v2 = vpop.permute.xlu1 %269 }
  0xc1   :  { %v276_v6 = vmul.f32 %v275_v0, %v270_v2 }
  0xc3   :  { %v277_v11 = vadd.f32 %v276_v6, %v267_v5 }
  0xf4   :  { %v252_v8 = vpop.f32.mrb[0].mxu0 }
  0xf5   :  { %v253_v12 = vadd.f32 %v252_v8, %v181_v7  ;;  %v574_v13 = vpop.f32.mrb[1].mxu0 }
  0xf7   :  { %v278_v15 = vadd.f32 %v277_v11, %v253_v12 }
  0xf9   :  { %v286_v16 = vadd.f32 %v522_v14, %v278_v15 }
  0xfb   :  { %vm287_vm2 = vcmp.ge.f32.partialorder %v286_v16, 0.0  ;;  %v288_v17 = vmul.f32 0.1, %v286_v16 }
  0xfd   :  { %v289_v9 = vsel %vm287_vm2, %v286_v16, %v288_v17 }
  0xfe   :  { %608 = vmatmul.mubr.f32.vlgmr.msra.gmra.mrb[0].mxu1 %v289_v9 }
 0x1d1   :  { %v379_v21 = vpop.f32.mrb[0].mxu1 }
 0x1d2   :  { %v380_v1 = vadd.f32 %v523_v20, %v379_v21  ;;  %v609_v22 = vpop.f32.mrb[1].mxu1 }
 0x1d4   :  { %vm383_vm3 = vcmp.ge.f32.partialorder %v380_v1, 0.0  ;;  %v384_v23 = vmul.f32 0.1, %v380_v1 }
 0x1d6   :  { %v385_v24 = vsel %vm383_vm3, %v380_v1, %v384_v23 }
 0x1d7   :  { %643 = vmatmul.mubr.f32.vlgmr.msra.gmra.mrb[2].mxu0 %v385_v24 }
 0x2aa   :  { %v475_v26 = vpop.f32.mrb[2].mxu0 }
 0x2ab   :  { %v476_v27 = vadd.f32 %v524_v25, %v475_v26  ;;  %v644_v28 = vpop.f32.mrb[3].mxu0 }
 0x2ad   :  { %480 = vst.msk [vmem:[#allocation5] sm:$0xff] %vm479_vm4, %v476_v27 }
 0x2b4   :  { %v498_v29 = vld [vmem:[#allocation5] sm:$0x3] }
 0x2b5   :  { %499 = vst [vmem:[%s1004_s11] sm:$0x3] %v498_v29 }
 0x2b6   :  { %516 = vsyncpa [#allocation4], 1 }

// kernel: tpu_custom_call.1
= control target key start
LH: loop header
LB: loop body
LE: loop exit
PB: predicated region body
PF: predicated region fallthrough
CT: control target
= control target key end

     0   :  { %s993_s0 = inlined_call_operand.vmem [shape: f32[2,32], index: 0, kind: input, shape index: {}]   ;;  %s994_s1 = inlined_call_operand.vmem [shape: f32[2,12], index: 1, kind: input, shape index: {}]   ;;  %s995_s2 = inlined_call_operand.vmem [shape: f32[2,2], index: 2, kind: input, shape index: {}]   ;;  %s996_s3 = inlined_call_operand.hbm [shape: f32[32,128], index: 3, kind: input, shape index: {}]   ;;  %s997_s4 = inlined_call_operand.vmem [shape: f32[12,128], index: 4, kind: input, shape index: {}]   ;;  %s998_s5 = inlined_call_operand.vmem [shape: f32[2,128], index: 5, kind: input, shape index: {}]   ;;  %s999_s6 = inlined_call_operand.vmem [shape: f32[1,128], index: 6, kind: input, shape index: {}]   ;;  %s1000_s7 = inlined_call_operand.vmem [shape: f32[128,128], index: 7, kind: input, shape index: {}]   ;;  %s1001_s8 = inlined_call_operand.vmem [shape: f32[1,128], index: 8, kind: input, shape index: {}]   ;;  %s1002_s9 = inlined_call_operand.vmem [shape: f32[128,1], index: 9, kind: input, shape index: {}]   ;;  %s1003_s10 = inlined_call_operand.<no memory space> [shape: f32[1,1], index: 10, kind: input, shape index: {}]   ;;  %s1004_s11 = inlined_call_operand.vmem [shape: f32[2,1], index: 11, kind: output, shape index: {}]  }
   0x1   :  { %v16_v0 = vstv %s1003_s10 }
   0x2   :  { %17 = vst [vmem:[#allocation2] sm:$0x1] %v16_v0 }
   0x3   :  { %18 = vsyncpa [#allocation4], 0  ;;  %s756_s19 = smov [#allocation3]   ;;  %s732_s23 = scalar_lea.hbm %s996_s3, 512 }
   0x4   :  { %s30_s20 = sshll.u32 %s756_s19, 4  ;;  %p733_p0 = scmp.ne.s32.totalorder %s996_s3, %s732_s23  ;;  %s31_s20 = int_to_ptr.vmem [resolvable:$true] %s30_s20 }
   0x5   :  { %p736_p1 = scmp.lt.u32.totalorder %s732_s23, %s996_s3 }
   0x7   :  { %p738_p2 = pnand %p736_p1, %p733_p0 }
   0x9   :  { %741 = shalt.err (!%p738_p2)
}
   0xa   :  { %s742_s10 = scalar_lea.vmem %s31_s20, 512  ;;  %p747_p4 = scmp.lt.s32.totalorder %s31_s20, %s31_s20 }
   0xb   :  { %p743_p3 = scmp.ne.s32.totalorder %s31_s20, %s742_s10  ;;  %p748_p5 = scmp.lt.s32.totalorder %s742_s10, %s742_s10 }
   0xd   :  { %p749_p6 = por %p748_p5, %p747_p4 }
   0xf   :  { %p750_p7 = pnand %p749_p6, %p743_p3 }
  0x11   :  { %753 = shalt.err (!%p750_p7)
}
  0x12   :  { %s757_s28 = smov 128   ;;  %s758_s29 = smov 8  }
  0x13   :  { %36 = dma.hbm_to_vmem [thread:$0]  %s996_s3, 512, %s31_s20, [#allocation4], %s757_s28, %s757_s28, %s758_s29  }
  0x14   :  { %754 = dma.done.wait [#allocation4], 512  }
  0x15   :  { %755 = vsyncadd [#allocation4], 4294966784  ;;  %v759_v1 = vmov 0.0|0.0   ;;  %vm760_vm0 = vmmov 0   ;;  %v761_v2 = vmov 0.0   ;;  %v762_v3 = vmov 2  }
  0x16   :  { %645 = vmatprep.subr.bf16.mxu0 %v759_v1  ;;  %572 = vmatprep.mubr.msk.f32.mxu0 %vm760_vm0, %v761_v2  ;;  %v763_v4 = vmov 0   ;;  %v55_v5 = vld [vmem:[#allocation3] sm:$0xff]  ;;  %v56_v6 = vld [vmem:[#allocation3 + $0x8] sm:$0xff]  ;;  %v57_v7 = vld [vmem:[#allocation3 + $0x10] sm:$0xff]  ;;  %v764_v12 = vmov 3   ;;  %v765_v13 = vmov 1  }
  0x17   :  { %719 = vset.pattern.permute.xlu1 %v762_v3  ;;  %717 = vset.pattern.permute.xlu0 %v763_v4  ;;  %v646_v8 = vpack.c.bf16 %v56_v6, %v55_v5  ;;  %v58_v9 = vld [vmem:[#allocation3 + $0x18] sm:$0xff]  ;;  %vm182_vm1 = vcmask 261120   ;;  %v766_v15 = vmov 4   ;;  %v767_v16 = vmov 5   ;;  %v291_v25 = vld [vmem:[%s1000_s7 + $0x8] sm:$0xff]  ;;  %v292_v26 = vld [vmem:[%s1000_s7 + $0x10] sm:$0xff] }
  0x18   :  { %651 = vmatprep.subr.bf16.mxu1 %v759_v1  ;;  %607 = vmatprep.mubr.msk.f32.mxu1 %vm760_vm0, %v761_v2  ;;  %v59_v10 = vld [vmem:[%s994_s1] sm:$0xff]  ;;  %v649_v11 = vpack.c.bf16 %v58_v9, %v57_v7  ;;  %v768_v17 = vmov 6   ;;  %v769_v18 = vmov 8   ;;  %v770_v19 = vmov 7   ;;  %v293_v28 = vld [vmem:[%s1000_s7 + $0x18] sm:$0xff]  ;;  %v295_v31 = vld [vmem:[%s1000_s7 + $0x28] sm:$0xff] }
  0x19   :  { %83 = vperm.xlu1 %719, %v59_v10   ;;  %64 = vperm.xlu0 %717, %v59_v10   ;;  %v54_v14 = vld [vmem:[%s993_s0] sm:$0xff]  ;;  %v771_v20 = vmov 11   ;;  %v772_v21 = vmov 9   ;;  %v773_v22 = vmov 10   ;;  %v655_v29 = vpack.c.bf16 %v293_v28, %v292_v26  ;;  %v296_v33 = vld [vmem:[%s1000_s7 + $0x30] sm:$0xff]  ;;  %v297_v34 = vld [vmem:[%s1000_s7 + $0x38] sm:$0xff] }
  0x1a   :  { %647 = vmatpush3.bf16.msra.mxu0 %v646_v8  ;;  %v256_v23 = vld [vmem:[%s995_s2] sm:$0xff]  ;;  %v661_v35 = vpack.c.bf16 %v297_v34, %v296_v33  ;;  %v299_v37 = vld [vmem:[%s1000_s7 + $0x48] sm:$0xff]  ;;  %v300_v39 = vld [vmem:[%s1000_s7 + $0x50] sm:$0xff]  ;;  %v67_v6 = vlaneseq  ;;  %vm479_vm4 = vcmask 7168  }
  0x1b   :  { %648 = vmatprep.subr.bf16.mxu0 %v759_v1  ;;  %v290_v24 = vld [vmem:[%s1000_s7] sm:$0xff]  ;;  %v301_v40 = vld [vmem:[%s1000_s7 + $0x58] sm:$0xff]  ;;  %v303_v43 = vld [vmem:[%s1000_s7 + $0x68] sm:$0xff] }
  0x1c   :  { %v652_v27 = vpack.c.bf16 %v291_v25, %v290_v24  ;;  %v294_v30 = vld [vmem:[%s1000_s7 + $0x20] sm:$0xff]  ;;  %v667_v41 = vpack.c.bf16 %v301_v40, %v300_v39  ;;  %v304_v45 = vld [vmem:[%s1000_s7 + $0x70] sm:$0xff]  ;;  %v305_v46 = vld [vmem:[%s1000_s7 + $0x78] sm:$0xff]  ;;  %v68_v7 = vshrl.u32 %v67_v6, 7 }
  0x1d   :  { %720 = vset.pattern.permute.xlu1 %v764_v12  ;;  %718 = vset.pattern.permute.xlu0 %v765_v13  ;;  %v658_v32 = vpack.c.bf16 %v295_v31, %v294_v30  ;;  %v298_v36 = vld [vmem:[%s1000_s7 + $0x40] sm:$0xff]  ;;  %v673_v47 = vpack.c.bf16 %v305_v46, %v304_v45  ;;  %v387_v49 = vld [vmem:[%s1002_s9 + $0x8] sm:$0xff]  ;;  %v388_v50 = vld [vmem:[%s1002_s9 + $0x10] sm:$0xff] }
  0x1e   :  { %650 = vmatpush3.bf16.msra.mxu0 %v649_v11  ;;  %93 = vperm.xlu1 %720, %v59_v10   ;;  %v664_v38 = vpack.c.bf16 %v299_v37, %v298_v36  ;;  %v302_v42 = vld [vmem:[%s1000_s7 + $0x60] sm:$0xff]  ;;  %v389_v52 = vld [vmem:[%s1002_s9 + $0x18] sm:$0xff]  ;;  %v391_v55 = vld [vmem:[%s1002_s9 + $0x28] sm:$0xff]  ;;  %v69_v9 = vsub.s32 0, %v68_v7  ;;  %v108_v24 = vsub.s32 4, %v68_v7  ;;  %v128_v33 = vsub.s32 6, %v68_v7 }
  0x1f   :  { %73 = vperm.xlu0 %718, %v59_v10   ;;  %675 = vmatprep.subr.bf16.mxu0 %v759_v1  ;;  %v670_v44 = vpack.c.bf16 %v303_v43, %v302_v42  ;;  %v386_v48 = vld [vmem:[%s1002_s9] sm:$0xff]  ;;  %v679_v53 = vpack.c.bf16 %v389_v52, %v388_v50  ;;  %v392_v57 = vld [vmem:[%s1002_s9 + $0x30] sm:$0xff]  ;;  %v393_v58 = vld [vmem:[%s1002_s9 + $0x38] sm:$0xff]  ;;  %v138_v39 = vsub.s32 7, %v68_v7 }
  0x20   :  { %653 = vmatpush3.bf16.msra.mxu1 %v652_v27  ;;  %v676_v51 = vpack.c.bf16 %v387_v49, %v386_v48  ;;  %v390_v54 = vld [vmem:[%s1002_s9 + $0x20] sm:$0xff]  ;;  %v685_v59 = vpack.c.bf16 %v393_v58, %v392_v57  ;;  %v395_v61 = vld [vmem:[%s1002_s9 + $0x48] sm:$0xff]  ;;  %v396_v63 = vld [vmem:[%s1002_s9 + $0x50] sm:$0xff] }
  0x21   :  { %573 = vmatmul.mubr.msk.f32.vlgmr.msra.gmra.mrb[0].mxu0 %vm182_vm1, %v54_v14  ;;  %654 = vmatprep.subr.bf16.mxu1 %v759_v1  ;;  %v682_v56 = vpack.c.bf16 %v391_v55, %v390_v54  ;;  %v394_v60 = vld [vmem:[%s1002_s9 + $0x40] sm:$0xff]  ;;  %v397_v0 = vld [vmem:[%s1002_s9 + $0x58] sm:$0xff] }
  0x22   :  { %721 = vset.pattern.permute.xlu1 %v766_v15  ;;  %642 = vmatprep.mubr.msk.f32.mxu0 %vm760_vm0, %v761_v2  ;;  %v688_v62 = vpack.c.bf16 %v395_v61, %v394_v60  ;;  %v691_v2 = vpack.c.bf16 %v397_v0, %v396_v63  ;;  %v398_v3 = vld [vmem:[%s1002_s9 + $0x60] sm:$0xff] }
  0x23   :  { %103 = vperm.xlu1 %721, %v59_v10   ;;  %722 = vset.pattern.permute.xlu0 %v767_v16  ;;  %v60_v11 = vld [vmem:[%s997_s4] sm:$0xff] }
  0x24   :  { %113 = vperm.xlu0 %722, %v59_v10   ;;  %656 = vmatpush3.bf16.msra.mxu1 %v655_v29  ;;  %v70_v14 = vrot.slane %v60_v11, %v69_v9  ;;  %v109_v28 = vrot.slane %v60_v11, %v108_v24  ;;  %v118_v29 = vsub.s32 5, %v68_v7  ;;  %v129_v37 = vrot.slane %v60_v11, %v128_v33  ;;  %v257_v58 = vld [vmem:[%s998_s5] sm:$0x3] }
  0x25   :  { %657 = vmatprep.subr.bf16.mxu1 %v759_v1  ;;  %677 = vmatpush3.bf16.msra.mxu0 %v676_v51  ;;  %v139_v43 = vrot.slane %v60_v11, %v138_v39  ;;  %v266_v63 = vrot.slane %v257_v58, %v69_v9 }
  0x26   :  { %678 = vmatprep.subr.bf16.mxu0 %v759_v1  ;;  %v119_v34 = vrot.slane %v60_v11, %v118_v29 }
  0x27   :  { %723 = vset.pattern.permute.xlu1 %v768_v17 }
  0x28   :  { %123 = vperm.xlu1 %723, %v59_v10   ;;  %725 = vset.pattern.permute.xlu0 %v769_v18 }
  0x29   :  { %143 = vperm.xlu0 %725, %v59_v10   ;;  %659 = vmatpush3.bf16.msra.mxu1 %v658_v32 }
  0x2a   :  { %660 = vmatprep.subr.bf16.mxu1 %v759_v1  ;;  %680 = vmatpush3.bf16.msra.mxu0 %v679_v53 }
  0x2b   :  { %681 = vmatprep.subr.bf16.mxu0 %v759_v1 }
  0x2c   :  { %724 = vset.pattern.permute.xlu1 %v770_v19 }
  0x2d   :  { %133 = vperm.xlu1 %724, %v59_v10   ;;  %728 = vset.pattern.permute.xlu0 %v771_v20  ;;  %v98_v20 = vsub.s32 3, %v68_v7 }
  0x2e   :  { %173 = vperm.xlu0 %728, %v59_v10   ;;  %662 = vmatpush3.bf16.msra.mxu1 %v661_v35 }
  0x2f   :  { %663 = vmatprep.subr.bf16.mxu1 %v759_v1  ;;  %683 = vmatpush3.bf16.msra.mxu0 %v682_v56 }
  0x30   :  { %684 = vmatprep.subr.bf16.mxu0 %v759_v1 }
  0x31   :  { %726 = vset.pattern.permute.xlu1 %v772_v21 }
  0x32   :  { %153 = vperm.xlu1 %726, %v59_v10   ;;  %731 = vset.pattern.permute.xlu0 %v765_v13 }
  0x33   :  { %665 = vmatpush3.bf16.msra.mxu1 %v664_v38  ;;  %686 = vmatpush3.bf16.msra.mxu0 %v685_v59 }
  0x34   :  { %666 = vmatprep.subr.bf16.mxu1 %v759_v1  ;;  %687 = vmatprep.subr.bf16.mxu0 %v759_v1 }
  0x36   :  { %727 = vset.pattern.permute.xlu1 %v773_v22  ;;  %v99_v22 = vrot.slane %v60_v11, %v98_v20 }
  0x37   :  { %163 = vperm.xlu1 %727, %v59_v10   ;;  %668 = vmatpush3.bf16.msra.mxu1 %v667_v41  ;;  %v78_v10 = vsub.s32 1, %v68_v7 }
  0x38   :  { %669 = vmatprep.subr.bf16.mxu1 %v759_v1  ;;  %689 = vmatpush3.bf16.msra.mxu0 %v688_v62 }
  0x39   :  { %690 = vmatprep.subr.bf16.mxu0 %v759_v1  ;;  %v79_v15 = vrot.slane %v60_v11, %v78_v10  ;;  %v275_v0 = vrot.slane %v257_v58, %v78_v10 }
  0x3b   :  { %729 = vset.pattern.permute.xlu1 %v763_v4  ;;  %671 = vmatpush3.bf16.msra.mxu1 %v670_v44  ;;  %v399_v4 = vld [vmem:[%s1002_s9 + $0x68] sm:$0xff] }
  0x3c   :  { %260 = vperm.xlu1 %729, %v256_v23   ;;  %672 = vmatprep.subr.bf16.mxu1 %v759_v1  ;;  %v694_v5 = vpack.c.bf16 %v399_v4, %v398_v3  ;;  %v61_v44 = vld [vmem:[%s997_s4 + $0x8] sm:$0xf] }
  0x3d   :  { %692 = vmatpush3.bf16.msra.mxu0 %v691_v2  ;;  %v149_v48 = vrot.slane %v61_v44, %v69_v9  ;;  %v159_v51 = vrot.slane %v61_v44, %v78_v10  ;;  %v179_v61 = vrot.slane %v61_v44, %v98_v20  ;;  %v400_v10 = vld [vmem:[%s1002_s9 + $0x70] sm:$0xff]  ;;  %v523_v20 = vld [vmem:[%s1001_s8] ss:$0 sm:$0xff] }
  0x3e   :  { %693 = vmatprep.subr.bf16.mxu0 %v759_v1 }
  0x3f   :  { %674 = vmatpush3.bf16.msra.mxu1 %v673_v47 }
  0x40   :  { %730 = vset.pattern.permute.xlu1 %v765_v13  ;;  %v88_v13 = vsub.s32 2, %v68_v7 }
  0x41   :  { %269 = vperm.xlu1 %730, %v256_v23   ;;  %695 = vmatpush3.bf16.msra.mxu0 %v694_v5 }
  0x42   :  { %696 = vmatprep.subr.bf16.mxu0 %v759_v1  ;;  %v89_v18 = vrot.slane %v60_v11, %v88_v13  ;;  %v169_v56 = vrot.slane %v61_v44, %v88_v13 }
  0x98   :  { %v65_v8 = vpop.permute.xlu0 %64  ;;  %v84_v12 = vpop.permute.xlu1 %83 }
  0x99   :  { %v71_v19 = vmul.f32 %v70_v14, %v65_v8  ;;  %v90_v1 = vmul.f32 %v89_v18, %v84_v12  ;;  %v522_v14 = vld [vmem:[%s999_s6] ss:$0 sm:$0xff]  ;;  %v401_v18 = vld [vmem:[%s1002_s9 + $0x78] sm:$0xff] }
  0x9d   :  { %v94_v17 = vpop.permute.xlu1 %93 }
  0x9e   :  { %v74_v16 = vpop.permute.xlu0 %73  ;;  %v100_v26 = vmul.f32 %v99_v22, %v94_v17 }
  0x9f   :  { %v80_v21 = vmul.f32 %v79_v15, %v74_v16 }
  0xa1   :  { %v81_v23 = vadd.f32 %v80_v21, %v71_v19  ;;  %v697_v19 = vpack.c.bf16 %v401_v18, %v400_v10 }
  0xa2   :  { %v104_v25 = vpop.permute.xlu1 %103 }
  0xa3   :  { %v91_v27 = vadd.f32 %v90_v1, %v81_v23  ;;  %v110_v32 = vmul.f32 %v109_v28, %v104_v25  ;;  %v114_v35 = vpop.permute.xlu0 %113  ;;  %698 = vmatpush3.bf16.msra.mxu0 %v697_v19  ;;  %v524_v25 = vld [vmem:[#allocation2] ss:$0 sm:$0xff] }
  0xa4   :  { %v120_v38 = vmul.f32 %v119_v34, %v114_v35 }
  0xa5   :  { %v101_v31 = vadd.f32 %v100_v26, %v91_v27 }
  0xa7   :  { %v124_v30 = vpop.permute.xlu1 %123  ;;  %v111_v36 = vadd.f32 %v110_v32, %v101_v31 }
  0xa8   :  { %v130_v41 = vmul.f32 %v129_v37, %v124_v30  ;;  %v144_v49 = vpop.permute.xlu0 %143 }
  0xa9   :  { %v121_v42 = vadd.f32 %v120_v38, %v111_v36  ;;  %v150_v52 = vmul.f32 %v149_v48, %v144_v49 }
  0xab   :  { %v131_v46 = vadd.f32 %v130_v41, %v121_v42 }
  0xac   :  { %v134_v40 = vpop.permute.xlu1 %133 }
  0xad   :  { %v140_v47 = vmul.f32 %v139_v43, %v134_v40  ;;  %v174_v62 = vpop.permute.xlu0 %173 }
  0xae   :  { %v180_v4 = vmul.f32 %v179_v61, %v174_v62 }
  0xaf   :  { %v141_v50 = vadd.f32 %v140_v47, %v131_v46 }
  0xb1   :  { %v154_v45 = vpop.permute.xlu1 %153  ;;  %v151_v55 = vadd.f32 %v150_v52, %v141_v50 }
  0xb2   :  { %v160_v54 = vmul.f32 %v159_v51, %v154_v45 }
  0xb4   :  { %v161_v59 = vadd.f32 %v160_v54, %v151_v55 }
  0xb6   :  { %v164_v53 = vpop.permute.xlu1 %163 }
  0xb7   :  { %v170_v60 = vmul.f32 %v169_v56, %v164_v53 }
  0xb9   :  { %v171_v3 = vadd.f32 %v170_v60, %v161_v59 }
  0xbb   :  { %v261_v57 = vpop.permute.xlu1 %260  ;;  %v181_v7 = vadd.f32 %v180_v4, %v171_v3 }
  0xbc   :  { %v267_v5 = vmul.f32 %v266_v63, %v261_v57 }
  0xc0   :  { %v270_v2 = vpop.permute.xlu1 %269 }
  0xc1   :  { %v276_v6 = vmul.f32 %v275_v0, %v270_v2 }
  0xc3   :  { %v277_v11 = vadd.f32 %v276_v6, %v267_v5 }
  0xf4   :  { %v252_v8 = vpop.f32.mrb[0].mxu0 }
  0xf5   :  { %v253_v12 = vadd.f32 %v252_v8, %v181_v7  ;;  %v574_v13 = vpop.f32.mrb[1].mxu0 }
  0xf7   :  { %v278_v15 = vadd.f32 %v277_v11, %v253_v12 }
  0xf9   :  { %v286_v16 = vadd.f32 %v522_v14, %v278_v15 }
  0xfb   :  { %vm287_vm2 = vcmp.ge.f32.partialorder %v286_v16, 0.0  ;;  %v288_v17 = vmul.f32 0.1, %v286_v16 }
  0xfd   :  { %v289_v9 = vsel %vm287_vm2, %v286_v16, %v288_v17 }
  0xfe   :  { %608 = vmatmul.mubr.f32.vlgmr.msra.gmra.mrb[0].mxu1 %v289_v9 }
 0x1d1   :  { %v379_v21 = vpop.f32.mrb[0].mxu1 }
 0x1d2   :  { %v380_v1 = vadd.f32 %v523_v20, %v379_v21  ;;  %v609_v22 = vpop.f32.mrb[1].mxu1 }
 0x1d4   :  { %vm383_vm3 = vcmp.ge.f32.partialorder %v380_v1, 0.0  ;;  %v384_v23 = vmul.f32 0.1, %v380_v1 }
 0x1d6   :  { %v385_v24 = vsel %vm383_vm3, %v380_v1, %v384_v23 }
 0x1d7   :  { %643 = vmatmul.mubr.f32.vlgmr.msra.gmra.mrb[2].mxu0 %v385_v24 }
 0x2aa   :  { %v475_v26 = vpop.f32.mrb[2].mxu0 }
 0x2ab   :  { %v476_v27 = vadd.f32 %v524_v25, %v475_v26  ;;  %v644_v28 = vpop.f32.mrb[3].mxu0 }
 0x2ad   :  { %480 = vst.msk [vmem:[#allocation5] sm:$0xff] %vm479_vm4, %v476_v27 }
 0x2b4   :  { %v498_v29 = vld [vmem:[#allocation5] sm:$0x3] }
 0x2b5   :  { %499 = vst [vmem:[%s1004_s11] sm:$0x3] %v498_v29 }
 0x2b6   :  { %516 = vsyncpa [#allocation4], 1 }

</bundles_post_ra>
